<compile_context>
chip_gen: v6e
topology: v6e:2x2x1
jax: 0.10.0
libtpu: 0.0.40
codegen_flags: <defaults>
</compile_context>

<pallas_src>
import functools

import jax
import jax.numpy as jnp
from jax.experimental import pallas as pl
from jax.experimental.pallas import tpu as pltpu

LEAK = 0.1


def _leaky(x):
    return jnp.where(x >= 0, x, LEAK * x)


def upflow_kernel(feat_ref, flow_ref, w1_ref, b1_ref, w2_ref, b2_ref,
                  ex_ref, comb_ref, out_ref, fim_ref, x1s_ref,
                  *, last_rows, w_real):
    """One (batch, row-strip) grid step.

    feat_ref: (TH+4, Wp+2, Cin)  bf16  raw, zero-padded feature strip
    flow_ref: (TH, Wp, 18)       bf16  3x3-unfolded 2*flow, channel = d*9 + k
    w1_ref:   (3, 3*Cin, C1)     bf16  [ky][kx*Cin + c]      b1_ref: (1, C1) f32
    w2_ref:   (3*C1, 3*C2)       bf16  [ky*C1 + c][kx*C2+co] (0.25 folded)
    b2_ref:   (1, C2)            f32   (0.25 folded)
    ex_ref:   (18, 2*C2)         bf16  flow 18 -> 72 lane-expansion selector
    comb_ref: (C2, 4)            bf16  9-tap group-sum selector
    out_ref:  (TH*Wp, 8)         f32   channel = d*4 + i*2 + j
    fim_ref:  VMEM (TH+4, Wp, 3*Cin) bf16  kx-im2col scratch
    x1s_ref:  VMEM (TH+2, Wp+8, C1)  bf16  padded conv1 activation (persistent)
    """
    THp4, Wp2, Cin = feat_ref.shape
    TH = THp4 - 4
    Wp = Wp2 - 2
    K1 = 3 * Cin
    C1 = w1_ref.shape[2]
    C2 = comb_ref.shape[0]
    Ws = x1s_ref.shape[1]                      # Wp + 8
    M = TH * Wp
    s = pl.program_id(1)
    last = pl.num_programs(1) - 1

    # ---- conv1: 3x3, bias, LeakyReLU -------------------------------------
    # kx im2col in-kernel (raw 36-ch feat in HBM instead of a 3x-inflated
    # wrapper im2col): three column-shifted copies into a 108-ch scratch.
    for kx in range(3):
        fim_ref[:, :, kx * Cin:(kx + 1) * Cin] = feat_ref[:, kx:kx + Wp, :]

    # 3 MXU dots over the ky taps, K = 3*Cin, bf16 operands / f32 accum.
    # TODO(synk): on v6e/v7x fold ky into the contraction too (single K=9*Cin
    # dot, ~33% fewer conv1 passes); kept as 3 aligned dots (v5e-neutral).
    acc1 = jnp.zeros(((TH + 2) * Wp, C1), jnp.float32)
    for ky in range(3):
        lhs = fim_ref[ky:ky + TH + 2, :, :].reshape((TH + 2) * Wp, K1)
        acc1 = acc1 + jnp.dot(lhs, w1_ref[ky],
                              preferred_element_type=jnp.float32)
    x1 = _leaky(acc1 + b1_ref[...])

    # Stage in the persistent padded bf16 scratch; re-establish the conv2 zero
    # padding: left col, plus every column at/right of the last real image
    # column (covers the right zero-pad and any ragged-W padding columns).
    x1s_ref[:, 1:Wp + 1, :] = x1.reshape(TH + 2, Wp, C1).astype(x1s_ref.dtype)
    x1s_ref[:, 0:1, :] = jnp.zeros((TH + 2, 1, C1), x1s_ref.dtype)
    x1s_ref[:, w_real + 1:, :] = jnp.zeros((TH + 2, Ws - w_real - 1, C1),
                                           x1s_ref.dtype)

    @pl.when(s == 0)            # top image boundary: conv2's zero-pad row
    def _():
        x1s_ref[0:1, :, :] = jnp.zeros((1, Ws, C1), x1s_ref.dtype)

    @pl.when(s == last)         # bottom boundary (+ any ragged-H pad rows)
    def _():
        x1s_ref[last_rows + 1:, :, :] = jnp.zeros(
            (TH + 1 - last_rows, Ws, C1), x1s_ref.dtype)

    # ---- conv2: ky folded into K (aligned lane concat), kx folded into N ---
    # One K=3*C1 / N=3*C2 MXU dot over the padded width, then shift-add of the
    # three 36-wide output slices (vs. 3 narrow N=36 dots before).
    cat = jnp.concatenate(
        [x1s_ref[0:TH, :, :], x1s_ref[1:TH + 1, :, :], x1s_ref[2:TH + 2, :, :]],
        axis=-1)                                          # (TH, Ws, 3*C1) bf16
    y2 = jnp.dot(cat.reshape(TH * Ws, 3 * C1), w2_ref[...],
                 preferred_element_type=jnp.float32)      # (TH*Ws, 3*C2)
    y2 = y2.reshape(TH, Ws, 3 * C2)
    pre = (y2[:, 0:Wp, 0:C2]
           + y2[:, 1:Wp + 1, C2:2 * C2]
           + y2[:, 2:Wp + 2, 2 * C2:3 * C2])              # (TH, Wp, C2)
    mask = _leaky(pre.reshape(M, C2) + b2_ref[...])       # 0.25 already folded

    # ---- softmax over the 9 taps per (i, j) + convex combination -----------
    # Full-width epilogue (no narrow-lane loops).  Per-pixel global max is
    # constant within every (i, j) group -> valid softmax stabilizer.
    gmax = jnp.max(mask, axis=-1, keepdims=True)
    e36 = jnp.exp(mask - gmax)                            # (M, 36) f32
    fl18 = flow_ref[...].reshape(M, 18)                   # bf16, channel d*9+k
    flxy = jnp.dot(fl18, ex_ref[...],
                   preferred_element_type=jnp.float32)    # (M, 72): d*36+k*4+ij
    ax = e36 * flxy[:, 0:C2]
    ay = e36 * flxy[:, C2:2 * C2]
    comb = comb_ref[...]
    bf = comb_ref.dtype
    den = jnp.dot(e36.astype(bf), comb, preferred_element_type=jnp.float32)
    numx = jnp.dot(ax.astype(bf), comb, preferred_element_type=jnp.float32)
    numy = jnp.dot(ay.astype(bf), comb, preferred_element_type=jnp.float32)
    # Guard against a fully-underflowed group, then exact reciprocal (EUP).
    inv = pl.reciprocal(jnp.maximum(den, 1e-30), approx=False)

    # TODO(synk): a lane-dense (8, TH*Wp) output (in-kernel transpose of the
    # two (M, 4) accumulators) would avoid 8-lane masked stores; kept in the
    # proven (pixels, 8) layout, the sublane->lane regroup stays in XLA.
    out_ref[:, 0:4] = numx * inv
    out_ref[:, 4:8] = numy * inv


def _round_up(x, m):
    return (x + m - 1) // m * m


def _vmem_bytes(shape, dtype):
    """Crude (8, 128)-tiled VMEM footprint of one buffer."""
    shape = (1,) * max(0, 2 - len(shape)) + tuple(shape)
    lead = 1
    for d in shape[:-2]:
        lead *= int(d)
    return (lead * _round_up(int(shape[-2]), 8) *
            _round_up(int(shape[-1]), 128) * jnp.dtype(dtype).itemsize)


def upflow_forward(flow_nchw, feat_nchw, params, max_strip_rows=8):
    """Pallas implementation of UpFlowNetwork.forward.

    flow_nchw: (N, 2, H, W)   feat_nchw: (N, ch_in_UF, H, W)
    returns:   (N, 2, 2H, 2W)

    max_strip_rows: strip height = VMEM / halo trade-off.  Raise on v5e/v6e
    (128 MiB VMEM) to amortize the 4-row halo; keep <= 8-16 on v7x (64 MiB).
    """
    w1, b1, w2, b2 = params
    N, _, H, W = flow_nchw.shape
    Cin = feat_nchw.shape[1]
    C1 = w1.shape[2]
    C2 = w2.shape[2]
    assert C2 == 36, "convex 2x upsampling requires scale_factor=4 (9*2*2 mask)"

    # Ragged-friendly tiling: H zero-padded up to a multiple of the strip
    # height, W zero-padded up to a multiple of 8 (sublane-aligned reshapes).
    TH = min(max_strip_rows, H)
    S = -(-H // TH)
    Hp = S * TH
    Wp = _round_up(W, 8)
    last_rows = H - (S - 1) * TH          # real output rows in the last strip

    # --- layout glue (no math): NCHW -> NHWC, zero pads, halo'd strips ------
    feat = jnp.transpose(feat_nchw, (0, 2, 3, 1)).astype(jnp.float32)
    flow = jnp.transpose(flow_nchw, (0, 2, 3, 1)).astype(jnp.float32)

    # feat: conv1 pad (2 rows / 1 col) + ragged H/W extension, raw 36-ch bf16
    # (the kx im2col happens in-kernel -> ~2.8x less feat HBM traffic).
    feat_p = jnp.pad(feat, ((0, 0), (2, 2 + Hp - H), (1, 1 + Wp - W),
                            (0, 0))).astype(jnp.bfloat16)
    feat_strips = jnp.stack(
        [feat_p[:, s * TH:s * TH + TH + 4] for s in range(S)], axis=1)

    # flow: 2*flow, 3x3 unfold, channel = d*9 + k (x block then y block), bf16
    flow_p = jnp.pad(2.0 * flow, ((0, 0), (1, 1 + Hp - H), (1, 1 + Wp - W),
                                  (0, 0)))
    flow_nb = jnp.stack(
        [flow_p[:, ky:ky + Hp, kx:kx + Wp, :]
         for ky in range(3) for kx in range(3)], axis=-1)   # (N, Hp, Wp, 2, 9)
    flow_strips = (flow_nb.reshape(N, Hp, Wp, 18).astype(jnp.bfloat16)
                   .reshape(N, S, TH, Wp, 18))

    # --- weight repacks: taps folded into MXU contraction / output dims -----
    w1f = w1.reshape(3, 3 * Cin, C1).astype(jnp.bfloat16)       # [ky][kx*Cin+c]
    # conv2: ky -> K, kx -> N; fold the 0.25 mask scale into w2/b2
    # (0.25 * leaky(z) == leaky(0.25 * z) since the leak slope is positive).
    w2n = (0.25 * jnp.transpose(w2.reshape(3, 3, C1, C2), (0, 2, 1, 3))
           .reshape(3 * C1, 3 * C2)).astype(jnp.bfloat16)
    b1f = b1.reshape(1, C1).astype(jnp.float32)
    b2f = (0.25 * b2).reshape(1, C2).astype(jnp.float32)

    # --- epilogue selector constants (exact in bf16: 0/1 entries) -----------
    ij = jnp.arange(C2) % 4
    comb = (ij[:, None] == jnp.arange(4)[None, :]).astype(jnp.bfloat16)
    r = jnp.arange(18)
    c = jnp.arange(2 * C2)
    expand = ((r[:, None] // 9 == c[None, :] // C2) &
              (r[:, None] % 9 == (c[None, :] % C2) // 4)).astype(jnp.bfloat16)

    # --- VMEM budget derived from actual block / scratch / temp sizes -------
    blocks = [((TH + 4, Wp + 2, Cin), jnp.bfloat16),
              ((TH, Wp, 18), jnp.bfloat16),
              ((3, 3 * Cin, C1), jnp.bfloat16), ((1, C1), jnp.float32),
              ((3 * C1, 3 * C2), jnp.bfloat16), ((1, C2), jnp.float32),
              ((18, 2 * C2), jnp.bfloat16), ((C2, 4), jnp.bfloat16),
              ((TH * Wp, 8), jnp.float32)]
    est = 2 * sum(_vmem_bytes(s_, d_) for s_, d_ in blocks)       # 2x buffered
    est += _vmem_bytes((TH + 4, Wp, 3 * Cin), jnp.bfloat16)       # fim scratch
    est += _vmem_bytes((TH + 2, Wp + 8, C1), jnp.bfloat16)        # x1s scratch
    est += 3 * _vmem_bytes(((TH + 2) * Wp, C1), jnp.float32)      # conv1 temps
    est += 2 * _vmem_bytes((TH * (Wp + 8), 3 * C2), jnp.float32)  # conv2 temps
    est += 8 * _vmem_bytes((TH * Wp, C2), jnp.float32)            # epilogue
    vmem_limit = int(min(max(2 * est, 32 * 2 ** 20), 112 * 2 ** 20))

    kernel = functools.partial(upflow_kernel, last_rows=last_rows, w_real=W)

    out = pl.pallas_call(
        kernel,
        out_shape=jax.ShapeDtypeStruct((N, S, TH * Wp, 8), jnp.float32),
        grid=(N, S),
        in_specs=[
            pl.BlockSpec((None, None, TH + 4, Wp + 2, Cin),
                         lambda n, s: (n, s, 0, 0, 0)),
            pl.BlockSpec((None, None, TH, Wp, 18),
                         lambda n, s: (n, s, 0, 0, 0)),
            pl.BlockSpec((3, 3 * Cin, C1), lambda n, s: (0, 0, 0)),
            pl.BlockSpec((1, C1), lambda n, s: (0, 0)),
            pl.BlockSpec((3 * C1, 3 * C2), lambda n, s: (0, 0)),
            pl.BlockSpec((1, C2), lambda n, s: (0, 0)),
            pl.BlockSpec((18, 2 * C2), lambda n, s: (0, 0)),
            pl.BlockSpec((C2, 4), lambda n, s: (0, 0)),
        ],
        out_specs=pl.BlockSpec((None, None, TH * Wp, 8),
                               lambda n, s: (n, s, 0, 0)),
        scratch_shapes=[
            pltpu.VMEM((TH + 4, Wp, 3 * Cin), jnp.bfloat16),   # kx-im2col feat
            pltpu.VMEM((TH + 2, Wp + 8, C1), jnp.bfloat16),    # padded conv1 act
        ],
        # TODO(synk): on v7x use pltpu.CORE_PARALLEL on the leading axis (or
        # pl.core_map) to guarantee 2-TensorCore sharding; "parallel" is a
        # no-op on single-core v5e/v6e.
        compiler_params=pltpu.CompilerParams(
            dimension_semantics=("parallel", "parallel"),
            vmem_limit_bytes=vmem_limit),
    )(feat_strips, flow_strips, w1f, b1f, w2n, b2f, expand, comb)

    # depth-to-space unpack (layout glue): out[n, s, h*Wp+w, d*4 + i*2 + j]
    up = out.reshape(N, Hp, Wp, 2, 2, 2)[:, :H, :W]     # (n, h, w, d, i, j)
    up = jnp.transpose(up, (0, 3, 1, 4, 2, 5))          # (n, d, h, i, w, j)
    return up.reshape(N, 2, 2 * H, 2 * W)


def ref_forward(flow_nchw, feat_nchw, params):
    """Pure-JAX (f32) reference mirroring the PyTorch semantics exactly."""
    w1, b1, w2, b2 = params
    N, _, H, W = flow_nchw.shape
    feat = jnp.transpose(feat_nchw, (0, 2, 3, 1)).astype(jnp.float32)
    flow = jnp.transpose(flow_nchw, (0, 2, 3, 1)).astype(jnp.float32)

    def conv3x3(x, w, b):
        xp = jnp.pad(x, ((0, 0), (1, 1), (1, 1), (0, 0)))
        acc = jnp.zeros(x.shape[:3] + (w.shape[2],), jnp.float32)
        for ky in range(3):
            for kx in range(3):
                acc = acc + jnp.einsum('nhwc,cd->nhwd',
                                       xp[:, ky:ky + H, kx:kx + W, :],
                                       w[ky * 3 + kx])
        return acc + b.reshape(1, 1, 1, -1)

    x1 = _leaky(conv3x3(feat, w1, b1))
    mask = 0.25 * _leaky(conv3x3(x1, w2, b2))            # (N, H, W, 36)
    m = jax.nn.softmax(mask.reshape(N, H, W, 9, 2, 2), axis=3)

    fp = jnp.pad(2.0 * flow, ((0, 0), (1, 1), (1, 1), (0, 0)))
    up = jnp.zeros((N, H, W, 2, 2, 2), jnp.float32)
    for ky in range(3):
        for kx in range(3):
            nb = fp[:, ky:ky + H, kx:kx + W, :]          # (N, H, W, 2)
            up = up + m[:, :, :, ky * 3 + kx, :, :, None] * \
                nb[:, :, :, None, None, :]
    up = jnp.transpose(up, (0, 5, 1, 3, 2, 4))           # (n, d, h, i, w, j)
    return up.reshape(N, 2, 2 * H, 2 * W)


def init_params(key, ch_in_UF=36, scale_factor=4):
    # Deterministic synthetic parameters (shapes from the module's __init__).
    k1, k2, k3, k4 = jax.random.split(key, 4)
    C1 = 128
    C2 = scale_factor * 9
    w1 = 0.05 * jax.random.normal(k1, (9, ch_in_UF, C1), jnp.float32)
    b1 = 0.05 * jax.random.normal(k2, (1, C1), jnp.float32)
    w2 = 0.05 * jax.random.normal(k3, (9, C1, C2), jnp.float32)
    b2 = 0.05 * jax.random.normal(k4, (1, C2), jnp.float32)
    return (w1, b1, w2, b2)


if __name__ == "__main__":
    N, H, W = 2, 8, 8
    ch_in_UF = 36

    key = jax.random.PRNGKey(0)
    kf, kg, kp = jax.random.split(key, 3)
    flow = jax.random.normal(kf, (N, 2, H, W), jnp.float32)
    feat = jax.random.normal(kg, (N, ch_in_UF, H, W), jnp.float32)
    params = init_params(kp, ch_in_UF=ch_in_UF, scale_factor=4)

    ref = ref_forward(flow, feat, params)
    # Single-strip and multi-strip (halo + boundary-row logic) paths.
    out_single = jax.block_until_ready(upflow_forward(flow, feat, params))
    out_multi = jax.block_until_ready(
        upflow_forward(flow, feat, params, max_strip_rows=4))

    # Ragged shapes: H not a multiple of the strip height, W not a multiple
    # of 8 (exercises the zero-padded strip + in-kernel re-zeroing path).
    Hr, Wr = 6, 6
    flow_r = jax.random.normal(kf, (N, 2, Hr, Wr), jnp.float32)
    feat_r = jax.random.normal(kg, (N, ch_in_UF, Hr, Wr), jnp.float32)
    ref_r = ref_forward(flow_r, feat_r, params)
    out_r = jax.block_until_ready(
        upflow_forward(flow_r, feat_r, params, max_strip_rows=4))

    assert out_single.shape == (N, 2, 2 * H, 2 * W), out_single.shape
    assert out_r.shape == (N, 2, 2 * Hr, 2 * Wr), out_r.shape
    # bf16 MXU operands + bf16-compressed unfolded flow -> relaxed tolerance
    # vs. the f32 reference (structural errors would be O(1)).
    for got, want in ((out_single, ref), (out_multi, ref), (out_r, ref_r)):
        err = float(jnp.max(jnp.abs(got - want)))
        assert jnp.allclose(got, want, rtol=5e-2, atol=8e-2), err

    print("KERNEL_OK")
</pallas_src>

<mosaic_0001>
module attributes {stable_mosaic.version = 11 : i64} {
  func.func @upflow_kernel(%arg0: i32, %arg1: i32, %arg2: memref<1x1x12x10x36xbf16, #tpu.memory_space<vmem>>, %arg3: memref<1x1x8x8x18xbf16, #tpu.memory_space<vmem>>, %arg4: memref<3x108x128xbf16, #tpu.memory_space<vmem>>, %arg5: memref<1x128xf32, #tpu.memory_space<vmem>>, %arg6: memref<384x108xbf16, #tpu.memory_space<vmem>>, %arg7: memref<1x36xf32, #tpu.memory_space<vmem>>, %arg8: memref<18x72xbf16, #tpu.memory_space<vmem>>, %arg9: memref<36x4xbf16, #tpu.memory_space<vmem>>, %arg10: memref<1x1x64x8xf32, #tpu.memory_space<vmem>>, %arg11: memref<12x8x108xbf16, #tpu.memory_space<vmem>>, %arg12: memref<10x16x128xbf16, #tpu.memory_space<vmem>>) attributes {dimension_semantics = [#tpu.dimension_semantics<parallel>, #tpu.dimension_semantics<parallel>], iteration_bounds = array<i64: 2, 1>, scalar_prefetch = 0 : i64, scratch_operands = 2 : i64, tpu.core_type = #tpu.core_type<tc>, window_params = [{transform_indices = @transform_0, window_bounds = array<i64: 1, 1, 12, 10, 36>}, {transform_indices = @transform_1, window_bounds = array<i64: 1, 1, 8, 8, 18>}, {pipeline_mode = #tpu.pipeline_mode<synchronous>, transform_indices = @transform_2, window_bounds = array<i64: 3, 108, 128>}, {pipeline_mode = #tpu.pipeline_mode<synchronous>, transform_indices = @transform_3, window_bounds = array<i64: 1, 128>}, {pipeline_mode = #tpu.pipeline_mode<synchronous>, transform_indices = @transform_4, window_bounds = array<i64: 384, 108>}, {pipeline_mode = #tpu.pipeline_mode<synchronous>, transform_indices = @transform_5, window_bounds = array<i64: 1, 36>}, {pipeline_mode = #tpu.pipeline_mode<synchronous>, transform_indices = @transform_6, window_bounds = array<i64: 18, 72>}, {pipeline_mode = #tpu.pipeline_mode<synchronous>, transform_indices = @transform_7, window_bounds = array<i64: 36, 4>}, {transform_indices = @transform_8, window_bounds = array<i64: 1, 1, 64, 8>}]} {
    %c0 = arith.constant 0 : index
    %c0_0 = arith.constant 0 : index
    %c0_1 = arith.constant 0 : index
    %c0_2 = arith.constant 0 : index
    %c0_3 = arith.constant 0 : index
    %0 = vector.load %arg2[%c0, %c0_0, %c0_1, %c0_2, %c0_3] : memref<1x1x12x10x36xbf16, #tpu.memory_space<vmem>>, vector<1x1x12x8x36xbf16>
    %1 = vector.shape_cast %0 : vector<1x1x12x8x36xbf16> to vector<12x8x36xbf16>
    %c0_4 = arith.constant 0 : index
    %c0_5 = arith.constant 0 : index
    %c0_6 = arith.constant 0 : index
    %2 = vector.load %arg11[%c0_4, %c0_5, %c0_6] : memref<12x8x108xbf16, #tpu.memory_space<vmem>>, vector<12x8x36xbf16>
    tpu.vector_store %arg11[%c0_4, %c0_5, %c0_6], %1 {strides = array<i32>} : memref<12x8x108xbf16, #tpu.memory_space<vmem>>, vector<12x8x36xbf16>,
    %c0_7 = arith.constant 0 : index
    %c0_8 = arith.constant 0 : index
    %c0_9 = arith.constant 0 : index
    %c1 = arith.constant 1 : index
    %c0_10 = arith.constant 0 : index
    %3 = vector.load %arg2[%c0_7, %c0_8, %c0_9, %c1, %c0_10] : memref<1x1x12x10x36xbf16, #tpu.memory_space<vmem>>, vector<1x1x12x8x36xbf16>
    %4 = vector.shape_cast %3 : vector<1x1x12x8x36xbf16> to vector<12x8x36xbf16>
    %c0_11 = arith.constant 0 : index
    %c0_12 = arith.constant 0 : index
    %c36 = arith.constant 36 : index
    %5 = vector.load %arg11[%c0_11, %c0_12, %c36] : memref<12x8x108xbf16, #tpu.memory_space<vmem>>, vector<12x8x36xbf16>
    tpu.vector_store %arg11[%c0_11, %c0_12, %c36], %4 {strides = array<i32>} : memref<12x8x108xbf16, #tpu.memory_space<vmem>>, vector<12x8x36xbf16>,
    %c0_13 = arith.constant 0 : index
    %c0_14 = arith.constant 0 : index
    %c0_15 = arith.constant 0 : index
    %c2 = arith.constant 2 : index
    %c0_16 = arith.constant 0 : index
    %6 = vector.load %arg2[%c0_13, %c0_14, %c0_15, %c2, %c0_16] : memref<1x1x12x10x36xbf16, #tpu.memory_space<vmem>>, vector<1x1x12x8x36xbf16>
    %7 = vector.shape_cast %6 : vector<1x1x12x8x36xbf16> to vector<12x8x36xbf16>
    %c0_17 = arith.constant 0 : index
    %c0_18 = arith.constant 0 : index
    %c72 = arith.constant 72 : index
    %8 = vector.load %arg11[%c0_17, %c0_18, %c72] : memref<12x8x108xbf16, #tpu.memory_space<vmem>>, vector<12x8x36xbf16>
    tpu.vector_store %arg11[%c0_17, %c0_18, %c72], %7 {strides = array<i32>} : memref<12x8x108xbf16, #tpu.memory_space<vmem>>, vector<12x8x36xbf16>,
    %cst = arith.constant 0.000000e+00 : f32
    %9 = vector.broadcast %cst : f32 to vector<80x128xf32>
    %c0_19 = arith.constant 0 : index
    %c0_20 = arith.constant 0 : index
    %c0_21 = arith.constant 0 : index
    %10 = vector.load %arg11[%c0_19, %c0_20, %c0_21] : memref<12x8x108xbf16, #tpu.memory_space<vmem>>, vector<10x8x108xbf16>
    %11 = vector.shape_cast %10 : vector<10x8x108xbf16> to vector<80x108xbf16>
    %c0_22 = arith.constant 0 : index
    %c0_23 = arith.constant 0 : index
    %c0_24 = arith.constant 0 : index
    %12 = vector.load %arg4[%c0_22, %c0_23, %c0_24] : memref<3x108x128xbf16, #tpu.memory_space<vmem>>, vector<1x108x128xbf16>
    %13 = vector.shape_cast %12 : vector<1x108x128xbf16> to vector<108x128xbf16>
    %cst_25 = arith.constant dense<0.000000e+00> : vector<80x128xf32>
    %14 = tpu.matmul %11, %13, %cst_25 {dimension_numbers = #tpu.dot_dimension_numbers<[1], [0], [0], [1], [0, 0, 1, 1], [], []>} : vector<80x108xbf16>, vector<108x128xbf16>, vector<80x128xf32> -> vector<80x128xf32>
    %15 = arith.addf %9, %14 : vector<80x128xf32>
    %c1_26 = arith.constant 1 : index
    %c0_27 = arith.constant 0 : index
    %c0_28 = arith.constant 0 : index
    %16 = vector.load %arg11[%c1_26, %c0_27, %c0_28] : memref<12x8x108xbf16, #tpu.memory_space<vmem>>, vector<10x8x108xbf16>
    %17 = vector.shape_cast %16 : vector<10x8x108xbf16> to vector<80x108xbf16>
    %c1_29 = arith.constant 1 : index
    %c0_30 = arith.constant 0 : index
    %c0_31 = arith.constant 0 : index
    %18 = vector.load %arg4[%c1_29, %c0_30, %c0_31] : memref<3x108x128xbf16, #tpu.memory_space<vmem>>, vector<1x108x128xbf16>
    %19 = vector.shape_cast %18 : vector<1x108x128xbf16> to vector<108x128xbf16>
    %cst_32 = arith.constant dense<0.000000e+00> : vector<80x128xf32>
    %20 = tpu.matmul %17, %19, %cst_32 {dimension_numbers = #tpu.dot_dimension_numbers<[1], [0], [0], [1], [0, 0, 1, 1], [], []>} : vector<80x108xbf16>, vector<108x128xbf16>, vector<80x128xf32> -> vector<80x128xf32>
    %21 = arith.addf %15, %20 : vector<80x128xf32>
    %c2_33 = arith.constant 2 : index
    %c0_34 = arith.constant 0 : index
    %c0_35 = arith.constant 0 : index
    %22 = vector.load %arg11[%c2_33, %c0_34, %c0_35] : memref<12x8x108xbf16, #tpu.memory_space<vmem>>, vector<10x8x108xbf16>
    %23 = vector.shape_cast %22 : vector<10x8x108xbf16> to vector<80x108xbf16>
    %c2_36 = arith.constant 2 : index
    %c0_37 = arith.constant 0 : index
    %c0_38 = arith.constant 0 : index
    %24 = vector.load %arg4[%c2_36, %c0_37, %c0_38] : memref<3x108x128xbf16, #tpu.memory_space<vmem>>, vector<1x108x128xbf16>
    %25 = vector.shape_cast %24 : vector<1x108x128xbf16> to vector<108x128xbf16>
    %cst_39 = arith.constant dense<0.000000e+00> : vector<80x128xf32>
    %26 = tpu.matmul %23, %25, %cst_39 {dimension_numbers = #tpu.dot_dimension_numbers<[1], [0], [0], [1], [0, 0, 1, 1], [], []>} : vector<80x108xbf16>, vector<108x128xbf16>, vector<80x128xf32> -> vector<80x128xf32>
    %27 = arith.addf %21, %26 : vector<80x128xf32>
    %c0_40 = arith.constant 0 : index
    %c0_41 = arith.constant 0 : index
    %28 = vector.load %arg5[%c0_40, %c0_41] : memref<1x128xf32, #tpu.memory_space<vmem>>, vector<1x128xf32>
    %29 = vector.broadcast %28 : vector<1x128xf32> to vector<80x128xf32>
    %30 = arith.addf %27, %29 : vector<80x128xf32>
    %cst_42 = arith.constant 0.000000e+00 : f32
    %31 = vector.broadcast %cst_42 : f32 to vector<80x128xf32>
    %32 = arith.cmpf oge, %30, %31 : vector<80x128xf32>
    %cst_43 = arith.constant 1.000000e-01 : f32
    %33 = vector.broadcast %cst_43 : f32 to vector<80x128xf32>
    %34 = arith.mulf %33, %30 : vector<80x128xf32>
    %35 = arith.select %32, %30, %34 : vector<80x128xi1>, vector<80x128xf32>
    %36 = vector.shape_cast %35 : vector<80x128xf32> to vector<10x8x128xf32>
    %37 = arith.truncf %36 : vector<10x8x128xf32> to vector<10x8x128xbf16>
    %c0_44 = arith.constant 0 : index
    %c1_45 = arith.constant 1 : index
    %c0_46 = arith.constant 0 : index
    %38 = vector.load %arg12[%c0_44, %c1_45, %c0_46] : memref<10x16x128xbf16, #tpu.memory_space<vmem>>, vector<10x8x128xbf16>
    tpu.vector_store %arg12[%c0_44, %c1_45, %c0_46], %37 {strides = array<i32>} : memref<10x16x128xbf16, #tpu.memory_space<vmem>>, vector<10x8x128xbf16>,
    %cst_47 = arith.constant 0.000000e+00 : bf16
    %39 = vector.broadcast %cst_47 : bf16 to vector<10x1x128xbf16>
    %c0_48 = arith.constant 0 : index
    %c0_49 = arith.constant 0 : index
    %c0_50 = arith.constant 0 : index
    %40 = vector.load %arg12[%c0_48, %c0_49, %c0_50] : memref<10x16x128xbf16, #tpu.memory_space<vmem>>, vector<10x1x128xbf16>
    tpu.vector_store %arg12[%c0_48, %c0_49, %c0_50], %39 {strides = array<i32>} : memref<10x16x128xbf16, #tpu.memory_space<vmem>>, vector<10x1x128xbf16>,
    %cst_51 = arith.constant 0.000000e+00 : bf16
    %41 = vector.broadcast %cst_51 : bf16 to vector<10x7x128xbf16>
    %c0_52 = arith.constant 0 : index
    %c9 = arith.constant 9 : index
    %c0_53 = arith.constant 0 : index
    %42 = vector.load %arg12[%c0_52, %c9, %c0_53] : memref<10x16x128xbf16, #tpu.memory_space<vmem>>, vector<10x7x128xbf16>
    tpu.vector_store %arg12[%c0_52, %c9, %c0_53], %41 {strides = array<i32>} : memref<10x16x128xbf16, #tpu.memory_space<vmem>>, vector<10x7x128xbf16>,
    %c0_i32 = arith.constant 0 : i32
    %43 = arith.cmpi eq, %arg1, %c0_i32 : i32
    %44 = arith.extui %43 : i1 to i32
    %c0_i32_54 = arith.constant 0 : i32
    %45 = arith.cmpi ne, %44, %c0_i32_54 : i32
    scf.if %45 {
      %cst_95 = arith.constant 0.000000e+00 : bf16
      %103 = vector.broadcast %cst_95 : bf16 to vector<1x16x128xbf16>
      %c0_96 = arith.constant 0 : index
      %c0_97 = arith.constant 0 : index
      %c0_98 = arith.constant 0 : index
      %104 = vector.load %arg12[%c0_96, %c0_97, %c0_98] : memref<10x16x128xbf16, #tpu.memory_space<vmem>>, vector<1x16x128xbf16>
      tpu.vector_store %arg12[%c0_96, %c0_97, %c0_98], %103 {strides = array<i32>} : memref<10x16x128xbf16, #tpu.memory_space<vmem>>, vector<1x16x128xbf16>,
    } else {
    }
    %c0_i32_55 = arith.constant 0 : i32
    %46 = arith.cmpi eq, %arg1, %c0_i32_55 : i32
    %47 = arith.extui %46 : i1 to i32
    %c0_i32_56 = arith.constant 0 : i32
    %48 = arith.cmpi ne, %47, %c0_i32_56 : i32
    scf.if %48 {
      %cst_95 = arith.constant 0.000000e+00 : bf16
      %103 = vector.broadcast %cst_95 : bf16 to vector<1x16x128xbf16>
      %c9_96 = arith.constant 9 : index
      %c0_97 = arith.constant 0 : index
      %c0_98 = arith.constant 0 : index
      %104 = vector.load %arg12[%c9_96, %c0_97, %c0_98] : memref<10x16x128xbf16, #tpu.memory_space<vmem>>, vector<1x16x128xbf16>
      tpu.vector_store %arg12[%c9_96, %c0_97, %c0_98], %103 {strides = array<i32>} : memref<10x16x128xbf16, #tpu.memory_space<vmem>>, vector<1x16x128xbf16>,
    } else {
    }
    %c0_57 = arith.constant 0 : index
    %c0_58 = arith.constant 0 : index
    %c0_59 = arith.constant 0 : index
    %49 = vector.load %arg12[%c0_57, %c0_58, %c0_59] : memref<10x16x128xbf16, #tpu.memory_space<vmem>>, vector<8x16x128xbf16>
    %c1_60 = arith.constant 1 : index
    %c0_61 = arith.constant 0 : index
    %c0_62 = arith.constant 0 : index
    %50 = vector.load %arg12[%c1_60, %c0_61, %c0_62] : memref<10x16x128xbf16, #tpu.memory_space<vmem>>, vector<8x16x128xbf16>
    %c2_63 = arith.constant 2 : index
    %c0_64 = arith.constant 0 : index
    %c0_65 = arith.constant 0 : index
    %51 = vector.load %arg12[%c2_63, %c0_64, %c0_65] : memref<10x16x128xbf16, #tpu.memory_space<vmem>>, vector<8x16x128xbf16>
    %52 = tpu.concatenate %49, %50, %51 in 2 : vector<8x16x128xbf16>, vector<8x16x128xbf16>, vector<8x16x128xbf16> -> vector<8x16x384xbf16>
    %53 = vector.shape_cast %52 : vector<8x16x384xbf16> to vector<128x384xbf16>
    %c0_66 = arith.constant 0 : index
    %c0_67 = arith.constant 0 : index
    %54 = vector.load %arg6[%c0_66, %c0_67] : memref<384x108xbf16, #tpu.memory_space<vmem>>, vector<384x108xbf16>
    %cst_68 = arith.constant dense<0.000000e+00> : vector<128x108xf32>
    %55 = tpu.matmul %53, %54, %cst_68 {dimension_numbers = #tpu.dot_dimension_numbers<[1], [0], [0], [1], [0, 0, 1, 1], [], []>} : vector<128x384xbf16>, vector<384x108xbf16>, vector<128x108xf32> -> vector<128x108xf32>
    %56 = vector.shape_cast %55 : vector<128x108xf32> to vector<8x16x108xf32>
    %57 = vector.extract_strided_slice %56 {offsets = [0, 0, 0], sizes = [8, 8, 36], strides = [1, 1, 1]} : vector<8x16x108xf32> to vector<8x8x36xf32>
    %58 = vector.extract_strided_slice %56 {offsets = [0, 1, 36], sizes = [8, 8, 36], strides = [1, 1, 1]} : vector<8x16x108xf32> to vector<8x8x36xf32>
    %59 = arith.addf %57, %58 : vector<8x8x36xf32>
    %60 = vector.extract_strided_slice %56 {offsets = [0, 2, 72], sizes = [8, 8, 36], strides = [1, 1, 1]} : vector<8x16x108xf32> to vector<8x8x36xf32>
    %61 = arith.addf %59, %60 : vector<8x8x36xf32>
    %62 = vector.shape_cast %61 : vector<8x8x36xf32> to vector<64x36xf32>
    %c0_69 = arith.constant 0 : index
    %c0_70 = arith.constant 0 : index
    %63 = vector.load %arg7[%c0_69, %c0_70] : memref<1x36xf32, #tpu.memory_space<vmem>>, vector<1x36xf32>
    %64 = vector.broadcast %63 : vector<1x36xf32> to vector<64x36xf32>
    %65 = arith.addf %62, %64 : vector<64x36xf32>
    %cst_71 = arith.constant 0.000000e+00 : f32
    %66 = vector.broadcast %cst_71 : f32 to vector<64x36xf32>
    %67 = arith.cmpf oge, %65, %66 : vector<64x36xf32>
    %cst_72 = arith.constant 1.000000e-01 : f32
    %68 = vector.broadcast %cst_72 : f32 to vector<64x36xf32>
    %69 = arith.mulf %68, %65 : vector<64x36xf32>
    %70 = arith.select %67, %65, %69 : vector<64x36xi1>, vector<64x36xf32>
    %cst_73 = arith.constant dense<0xFF800000> : vector<64xf32>
    %71 = vector.multi_reduction <maximumf>, %70, %cst_73 [1] : vector<64x36xf32> to vector<64xf32>
    %72 = vector.shape_cast %71 : vector<64xf32> to vector<64x1xf32>
    %73 = vector.broadcast %72 : vector<64x1xf32> to vector<64x36xf32>
    %74 = arith.subf %70, %73 : vector<64x36xf32>
    %75 = math.exp %74 : vector<64x36xf32>
    %c0_74 = arith.constant 0 : index
    %c0_75 = arith.constant 0 : index
    %c0_76 = arith.constant 0 : index
    %c0_77 = arith.constant 0 : index
    %c0_78 = arith.constant 0 : index
    %76 = vector.load %arg3[%c0_74, %c0_75, %c0_76, %c0_77, %c0_78] : memref<1x1x8x8x18xbf16, #tpu.memory_space<vmem>>, vector<1x1x8x8x18xbf16>
    %77 = vector.shape_cast %76 : vector<1x1x8x8x18xbf16> to vector<8x8x18xbf16>
    %78 = vector.shape_cast %77 : vector<8x8x18xbf16> to vector<64x18xbf16>
    %c0_79 = arith.constant 0 : index
    %c0_80 = arith.constant 0 : index
    %79 = vector.load %arg8[%c0_79, %c0_80] : memref<18x72xbf16, #tpu.memory_space<vmem>>, vector<18x72xbf16>
    %cst_81 = arith.constant dense<0.000000e+00> : vector<64x72xf32>
    %80 = tpu.matmul %78, %79, %cst_81 {dimension_numbers = #tpu.dot_dimension_numbers<[1], [0], [0], [1], [0, 0, 1, 1], [], []>} : vector<64x18xbf16>, vector<18x72xbf16>, vector<64x72xf32> -> vector<64x72xf32>
    %81 = vector.extract_strided_slice %80 {offsets = [0, 0], sizes = [64, 36], strides = [1, 1]} : vector<64x72xf32> to vector<64x36xf32>
    %82 = arith.mulf %75, %81 : vector<64x36xf32>
    %83 = vector.extract_strided_slice %80 {offsets = [0, 36], sizes = [64, 36], strides = [1, 1]} : vector<64x72xf32> to vector<64x36xf32>
    %84 = arith.mulf %75, %83 : vector<64x36xf32>
    %c0_82 = arith.constant 0 : index
    %c0_83 = arith.constant 0 : index
    %85 = vector.load %arg9[%c0_82, %c0_83] : memref<36x4xbf16, #tpu.memory_space<vmem>>, vector<36x4xbf16>
    %86 = arith.truncf %75 : vector<64x36xf32> to vector<64x36xbf16>
    %cst_84 = arith.constant dense<0.000000e+00> : vector<64x4xf32>
    %87 = tpu.matmul %86, %85, %cst_84 {dimension_numbers = #tpu.dot_dimension_numbers<[1], [0], [0], [1], [0, 0, 1, 1], [], []>} : vector<64x36xbf16>, vector<36x4xbf16>, vector<64x4xf32> -> vector<64x4xf32>
    %88 = arith.truncf %82 : vector<64x36xf32> to vector<64x36xbf16>
    %cst_85 = arith.constant dense<0.000000e+00> : vector<64x4xf32>
    %89 = tpu.matmul %88, %85, %cst_85 {dimension_numbers = #tpu.dot_dimension_numbers<[1], [0], [0], [1], [0, 0, 1, 1], [], []>} : vector<64x36xbf16>, vector<36x4xbf16>, vector<64x4xf32> -> vector<64x4xf32>
    %90 = arith.truncf %84 : vector<64x36xf32> to vector<64x36xbf16>
    %cst_86 = arith.constant dense<0.000000e+00> : vector<64x4xf32>
    %91 = tpu.matmul %90, %85, %cst_86 {dimension_numbers = #tpu.dot_dimension_numbers<[1], [0], [0], [1], [0, 0, 1, 1], [], []>} : vector<64x36xbf16>, vector<36x4xbf16>, vector<64x4xf32> -> vector<64x4xf32>
    %cst_87 = arith.constant 1.000000e-30 : f32
    %92 = vector.broadcast %cst_87 : f32 to vector<64x4xf32>
    %93 = arith.maximumf %87, %92 : vector<64x4xf32>
    %94 = tpu.reciprocal %93 : vector<64x4xf32> -> vector<64x4xf32>
    %95 = arith.mulf %89, %94 : vector<64x4xf32>
    %c0_88 = arith.constant 0 : index
    %c0_89 = arith.constant 0 : index
    %c0_90 = arith.constant 0 : index
    %c0_91 = arith.constant 0 : index
    %96 = vector.load %arg10[%c0_88, %c0_89, %c0_90, %c0_91] : memref<1x1x64x8xf32, #tpu.memory_space<vmem>>, vector<1x1x64x4xf32>
    %97 = vector.shape_cast %96 : vector<1x1x64x4xf32> to vector<64x4xf32>
    %98 = vector.shape_cast %95 : vector<64x4xf32> to vector<1x1x64x4xf32>
    tpu.vector_store %arg10[%c0_88, %c0_89, %c0_90, %c0_91], %98 {strides = array<i32>} : memref<1x1x64x8xf32, #tpu.memory_space<vmem>>, vector<1x1x64x4xf32>,
    %99 = arith.mulf %91, %94 : vector<64x4xf32>
    %c0_92 = arith.constant 0 : index
    %c0_93 = arith.constant 0 : index
    %c0_94 = arith.constant 0 : index
    %c4 = arith.constant 4 : index
    %100 = vector.load %arg10[%c0_92, %c0_93, %c0_94, %c4] : memref<1x1x64x8xf32, #tpu.memory_space<vmem>>, vector<1x1x64x4xf32>
    %101 = vector.shape_cast %100 : vector<1x1x64x4xf32> to vector<64x4xf32>
    %102 = vector.shape_cast %99 : vector<64x4xf32> to vector<1x1x64x4xf32>
    tpu.vector_store %arg10[%c0_92, %c0_93, %c0_94, %c4], %102 {strides = array<i32>} : memref<1x1x64x8xf32, #tpu.memory_space<vmem>>, vector<1x1x64x4xf32>,
    return
  }
  func.func @transform_0(%arg0: i32, %arg1: i32) -> (i32, i32, i32, i32, i32) {
    %c0_i32 = arith.constant 0 : i32
    %c0_i32_0 = arith.constant 0 : i32
    %c0_i32_1 = arith.constant 0 : i32
    %c0_i32_2 = arith.constant 0 : i32
    return %arg0, %arg1, %c0_i32, %c0_i32_0, %c0_i32_1 : i32, i32, i32, i32, i32
  }
  func.func @transform_1(%arg0: i32, %arg1: i32) -> (i32, i32, i32, i32, i32) {
    %c0_i32 = arith.constant 0 : i32
    %c0_i32_0 = arith.constant 0 : i32
    %c0_i32_1 = arith.constant 0 : i32
    %c0_i32_2 = arith.constant 0 : i32
    return %arg0, %arg1, %c0_i32, %c0_i32_0, %c0_i32_1 : i32, i32, i32, i32, i32
  }
  func.func @transform_2(%arg0: i32, %arg1: i32) -> (i32, i32, i32) {
    %c0_i32 = arith.constant 0 : i32
    %c0_i32_0 = arith.constant 0 : i32
    %c0_i32_1 = arith.constant 0 : i32
    %c0_i32_2 = arith.constant 0 : i32
    return %c0_i32, %c0_i32_0, %c0_i32_1 : i32, i32, i32
  }
  func.func @transform_3(%arg0: i32, %arg1: i32) -> (i32, i32) {
    %c0_i32 = arith.constant 0 : i32
    %c0_i32_0 = arith.constant 0 : i32
    %c0_i32_1 = arith.constant 0 : i32
    return %c0_i32, %c0_i32_0 : i32, i32
  }
  func.func @transform_4(%arg0: i32, %arg1: i32) -> (i32, i32) {
    %c0_i32 = arith.constant 0 : i32
    %c0_i32_0 = arith.constant 0 : i32
    %c0_i32_1 = arith.constant 0 : i32
    return %c0_i32, %c0_i32_0 : i32, i32
  }
  func.func @transform_5(%arg0: i32, %arg1: i32) -> (i32, i32) {
    %c0_i32 = arith.constant 0 : i32
    %c0_i32_0 = arith.constant 0 : i32
    %c0_i32_1 = arith.constant 0 : i32
    return %c0_i32, %c0_i32_0 : i32, i32
  }
  func.func @transform_6(%arg0: i32, %arg1: i32) -> (i32, i32) {
    %c0_i32 = arith.constant 0 : i32
    %c0_i32_0 = arith.constant 0 : i32
    %c0_i32_1 = arith.constant 0 : i32
    return %c0_i32, %c0_i32_0 : i32, i32
  }
  func.func @transform_7(%arg0: i32, %arg1: i32) -> (i32, i32) {
    %c0_i32 = arith.constant 0 : i32
    %c0_i32_0 = arith.constant 0 : i32
    %c0_i32_1 = arith.constant 0 : i32
    return %c0_i32, %c0_i32_0 : i32, i32
  }
  func.func @transform_8(%arg0: i32, %arg1: i32) -> (i32, i32, i32, i32) {
    %c0_i32 = arith.constant 0 : i32
    %c0_i32_0 = arith.constant 0 : i32
    %c0_i32_1 = arith.constant 0 : i32
    return %arg0, %arg1, %c0_i32, %c0_i32_0 : i32, i32, i32, i32
  }
}

</mosaic_0001>

<bundles_post_ra>
// kernel: tpu_custom_call.1
= control target key start
LH: loop header
LB: loop body
LE: loop exit
PB: predicated region body
PF: predicated region fallthrough
CT: control target
= control target key end

     0   :  { %s3874_s27 = smov 0   ;;  %s3876_s28 = smov 0   ;;  %s4690_s0 = inlined_call_operand.vmem [shape: bf16[2,1,12,10,36], index: 0, kind: input, shape index: {}]   ;;  %s4691_s1 = inlined_call_operand.vmem [shape: bf16[2,1,8,8,18], index: 1, kind: input, shape index: {}]   ;;  %s4692_s2 = inlined_call_operand.vmem [shape: bf16[3,108,128], index: 2, kind: input, shape index: {}]   ;;  %s4693_s3 = inlined_call_operand.vmem [shape: f32[1,128], index: 3, kind: input, shape index: {}]   ;;  %s4694_s4 = inlined_call_operand.vmem [shape: bf16[384,108], index: 4, kind: input, shape index: {}]   ;;  %s4695_s5 = inlined_call_operand.vmem [shape: f32[1,36], index: 5, kind: input, shape index: {}]   ;;  %s4696_s6 = inlined_call_operand.vmem [shape: bf16[18,72], index: 6, kind: input, shape index: {}]   ;;  %s4697_s7 = inlined_call_operand.vmem [shape: bf16[36,4], index: 7, kind: input, shape index: {}]   ;;  %s4698_s8 = inlined_call_operand.vmem [shape: f32[2,1,64,8], index: 8, kind: output, shape index: {}]  }
   0x1   :  { %s3878_s29 = smov 0  }
   0x2 LB: > { %s30_s30 = sadd.s32 1, %s3815_s28  ;;  %p3108_p0 = scmp.ge.s32.totalorder %s3819_s29, 1  ;;  %s3819_s29 = sphi %s3878_s29, %s18_s29   ;;  %s3815_s28 = sphi %s3876_s28, %s4708_s28   ;;  %s3811_s27 = sphi %s3874_s27, %s4707_s27  }
   0x3   : > { %p32_p1 = scmp.ge.s32.totalorder %s30_s30, 2  ;;  %p298_p2 = scmp.lt.s32.totalorder %s3819_s29, 3 }
   0x5   : > { %s4710_s30 = smov (%p32_p1, %s30_s30), 0  ;;  %p299_p3 = pnand %p3108_p0, %p298_p2 }
   0x6   : > { %p349_p4 = scmp.lt.s32.totalorder (!%p299_p3), %s3811_s27, 1  ;;  %s3822_s21 = smov (!%p299_p3), 72  }
   0x7   : > { %302 = sbr.rel (%p299_p3) target bundleno = 1312 (0x520), region = 52  ;;  %s3823_s22 = smov (!%p299_p3), 36  }
   0x8   : > { %s3827_s26 = smov (!%p299_p3), 56  }
   0xc   : > { %s4712_s27 = smov (!%p349_p4, %s3811_s27), 1  ;;  %vm426_vm0 = vsmask.f32 3328  ;;  %vm427_vm1 = vsmask.f32 7440  ;;  %v3821_v0 = vmov 0.0  }
   0xd   : > { %3447 = vmatprep.subr.bf16.mxu0 %v3821_v0  ;;  %v3672_v1 = vld [vmem:[%s4692_s2 + $0x68] sm:$0x3f]   ;;  %vm926_vm2 = vcmask 1045504   ;;  %3481 = vmatprep.subr.bf16.mxu1 %v3821_v0  ;;  %vm694_vm3 = vcmask 1042432   ;;  %s3639_s11 = smul.u32 96, %s4712_s27  ;;  %vm695_vm4 = vcmask 1046532   ;;  %vm3937_vm6 = vmor %vm426_vm0, %vm427_vm1 }
   0xe   : > { %v928_v2 = vsel %vm926_vm2, %v3672_v1, 0  ;;  %v3673_v3 = vld [vmem:[%s4692_s2 + $0x60] sm:$0xff]   ;;  %vm3915_vm5 = vmor %vm694_vm3, %vm695_vm4  ;;  %v3674_v16 = vld [vmem:[%s4692_s2 + $0x58] sm:$0xff]   ;;  %vm3824_vm7 = vmmov 0   ;;  %vm389_vm8 = vcmask 289792   ;;  %vm633_vm9 = vcmask 584992  }
   0xf   : > { %3448 = vmatpush3.bf16.msra.mxu0 %v928_v2  ;;  %s3907_s16 = scalar_lea.vmem %s4690_s0, %s3639_s11  ;;  %v3675_v27 = vld [vmem:[%s4692_s2 + $0x50] sm:$0xff]   ;;  %v3676_v57 = vld [vmem:[%s4692_s2 + $0x48] sm:$0xff]   ;;  %3461 = vmatprep.mubr.msk.bf16.mxu0 %vm3824_vm7, %v3821_v0  ;;  %vm781_vm10 = vcmask 880192   ;;  %vm910_vm11 = vcmask 883712   ;;  %vm1546_vm12 = vcmask 1040384   ;;  %vm1540_vm14 = vcmask 1043456  }
  0x10   : > { %3449 = vmatprep.subr.bf16.mxu0 %v3821_v0  ;;  %v404_v4 = vld [vmem:[%s3907_s16 + $0x8] sm:$0xf]  ;;  %v405_v5 = vld [vmem:[%s3907_s16 + $0xc] sm:$0x1]  ;;  %v406_v14 = vld [vmem:[%s3907_s16 + $0x10] sm:$0xf]  ;;  %3495 = vmatprep.mubr.msk.bf16.mxu1 %vm3824_vm7, %v3821_v0 }
  0x11   : > { %v648_v6 = vld [vmem:[%s3907_s16 + $0x8] sm:$0xe]  ;;  %v444_v7 = vshrl.u32 %v404_v4, 16  ;;  %v447_v8 = vshll.u32 %v404_v4, 16  ;;  %v453_v9 = vshll.u32 %v405_v5, 16  ;;  %v458_v20 = vshrl.u32 %v406_v14, 16 }
  0x12   : > { %v649_v10 = vld [vmem:[%s3907_s16 + $0xc] sm:$0x1]  ;;  %v3115_v12 = vrot.slane %v648_v6, 9  ;;  %v407_v15 = vld [vmem:[%s3907_s16 + $0x14] sm:$0x1]  ;;  %v461_v23 = vshll.u32 %v406_v14, 16 }
  0x13   : > { %v703_v13 = vrot.slane %v649_v10, 5  ;;  %3450 = vmatpush3.bf16.msra.mxu0 %v3673_v3  ;;  %v446_v17 = vrot.slane %v444_v7, 4  ;;  %v449_v18 = vrot.slane %v447_v8, 5  ;;  %v455_v19 = vrot.slane %v453_v9, 5  ;;  %v650_v21 = vld [vmem:[%s3907_s16 + $0x10] sm:$0xe] }
  0x14   : > { %3451 = vmatprep.subr.bf16.mxu0 %v3821_v0  ;;  %v467_v24 = vshll.u32 %v407_v15, 16  ;;  %v651_v25 = vld [vmem:[%s3907_s16 + $0x14] sm:$0x1]  ;;  %v3116_v26 = vrot.slane %v650_v21, 9  ;;  %v460_v29 = vrot.slane %v458_v20, 4  ;;  %v463_v34 = vrot.slane %v461_v23, 5 }
  0x15   : > { %v704_v22 = vsel %vm3915_vm5, %v3115_v12, %v703_v13  ;;  %v450_v28 = vor.u32 %v449_v18, %v446_v17  ;;  %v707_v30 = vrot.slane %v651_v25, 5  ;;  %v408_v31 = vld [vmem:[%s3907_s16 + $0x18] sm:$0xf]  ;;  %v409_v32 = vld [vmem:[%s3907_s16 + $0x1c] sm:$0x1]  ;;  %v3677_v4 = vld [vmem:[%s4692_s2 + $0x40] sm:$0xff]  }
  0x16   : > { %747 = vrot.lane.b32.xlu1 %v704_v22, %s3822_s21  ;;  %v469_v35 = vrot.slane %v467_v24, 5  ;;  %v472_v36 = vshrl.u32 %v408_v31, 16  ;;  %v475_v37 = vshll.u32 %v408_v31, 16  ;;  %v410_v38 = vld [vmem:[%s3907_s16 + $0x20] sm:$0xf]  ;;  %v481_v41 = vshll.u32 %v409_v32, 16 }
  0x17   : > { %3452 = vmatpush3.bf16.msra.mxu0 %v3674_v16  ;;  %v451_v39 = vrot.slane %v450_v28, 4  ;;  %v708_v40 = vsel %vm3915_vm5, %v3116_v26, %v707_v30  ;;  %v411_v42 = vld [vmem:[%s3907_s16 + $0x24] sm:$0x1]  ;;  %v486_v43 = vshrl.u32 %v410_v38, 16  ;;  %v464_v44 = vor.u32 %v463_v34, %v460_v29  ;;  %v3947_v48 = vld [vmem:[%s3907_s16 + $0x18] sm:$0xe] }
  0x18   : > { %3453 = vmatprep.subr.bf16.mxu0 %v3821_v0  ;;  %v474_v45 = vrot.slane %v472_v36, 4  ;;  %v477_v46 = vrot.slane %v475_v37, 5  ;;  %v489_v47 = vshll.u32 %v410_v38, 16  ;;  %v495_v51 = vshll.u32 %v411_v42, 16  ;;  %v653_v56 = vld [vmem:[%s3907_s16 + $0x1c] sm:$0x1] }
  0x19   : > { %v456_v49 = vsel %vm3937_vm6, %v451_v39, %v455_v19  ;;  %v488_v50 = vrot.slane %v486_v43, 4  ;;  %v465_v52 = vrot.slane %v464_v44, 4  ;;  %v483_v54 = vrot.slane %v481_v41, 5  ;;  %v654_v59 = vld [vmem:[%s3907_s16 + $0x20] sm:$0xe]  ;;  %v3678_v25 = vld [vmem:[%s4692_s2 + $0x38] sm:$0xff]  }
  0x1a   : > { %749 = vrot.lane.b32.xlu1 %v708_v40, %s3822_s21  ;;  %599 = vrot.lane.b32.xlu0 %v456_v49, %s3823_s22  ;;  %v478_v53 = vor.u32 %v477_v46, %v474_v45  ;;  %v491_v55 = vrot.slane %v489_v47, 5  ;;  %v3117_v58 = vrot.slane %v3947_v48, 9  ;;  %v655_v60 = vld [vmem:[%s3907_s16 + $0x24] sm:$0x1]  ;;  %v497_v1 = vrot.slane %v495_v51, 5  ;;  %v3692_v11 = vld [vmem:[%s4692_s2 + $0x10] sm:$0xff]  }
  0x1b   : > { %3454 = vmatpush3.bf16.msra.mxu0 %v3675_v27  ;;  %v470_v61 = vsel %vm3937_vm6, %v465_v52, %v469_v35  ;;  %v412_v2 = vld [vmem:[%s3907_s16 + $0x28] sm:$0xf]  ;;  %v413_v3 = vld [vmem:[%s3907_s16 + $0x2c] sm:$0x1]  ;;  %v711_v5 = vrot.slane %v653_v56, 5  ;;  %v3118_v12 = vrot.slane %v654_v59, 9 }
  0x1c   : > { %3455 = vmatprep.subr.bf16.mxu0 %v3821_v0  ;;  %v479_v62 = vrot.slane %v478_v53, 4  ;;  %v492_v63 = vor.u32 %v491_v55, %v488_v50  ;;  %v500_v6 = vshrl.u32 %v412_v2, 16  ;;  %v503_v7 = vshll.u32 %v412_v2, 16  ;;  %v414_v9 = vld [vmem:[%s3907_s16 + $0x30] sm:$0xf]  ;;  %v3693_v33 = vld [vmem:[%s4692_s2 + $0x8] sm:$0xff]  }
  0x1d   : > { %v509_v8 = vshll.u32 %v413_v3, 16  ;;  %v715_v13 = vrot.slane %v655_v60, 5  ;;  %v415_v14 = vld [vmem:[%s3907_s16 + $0x34] sm:$0x1]  ;;  %v514_v15 = vshrl.u32 %v414_v9, 16  ;;  %v517_v19 = vshll.u32 %v414_v9, 16 }
  0x1e   : > { %601 = vrot.lane.b32.xlu0 %v470_v61, %s3823_s22  ;;  %v493_v10 = vrot.slane %v492_v63, 4  ;;  %v484_v16 = vsel %vm3937_vm6, %v479_v62, %v483_v54  ;;  %v502_v17 = vrot.slane %v500_v6, 4  ;;  %v505_v18 = vrot.slane %v503_v7, 5  ;;  %v3978_v20 = vld [vmem:[%s3907_s16 + $0x28] sm:$0xe]  ;;  %s3292_s23 = sshll.u32 %s4712_s27, 5 }
  0x1f   : > { %3456 = vmatpush3.bf16.msra.mxu0 %v3676_v57  ;;  %v516_v22 = vrot.slane %v514_v15, 4  ;;  %v523_v23 = vshll.u32 %v415_v14, 16  ;;  %v657_v24 = vld [vmem:[%s3907_s16 + $0x2c] sm:$0x1]  ;;  %v511_v27 = vrot.slane %v509_v8, 5  ;;  %v519_v28 = vrot.slane %v517_v19, 5  ;;  %s366_s25 = scalar_lea.vmem %s4691_s1, %s3292_s23 }
  0x20   : > { %3457 = vmatprep.subr.bf16.mxu0 %v3821_v0  ;;  %v498_v21 = vsel %vm3937_vm6, %v493_v10, %v497_v1  ;;  %v506_v26 = vor.u32 %v505_v18, %v502_v17  ;;  %v658_v29 = vld [vmem:[%s3907_s16 + $0x30] sm:$0xe]  ;;  %v659_v30 = vld [vmem:[%s3907_s16 + $0x34] sm:$0x1]  ;;  %v716_v31 = vsel %vm3915_vm5, %v3118_v12, %v715_v13  ;;  %v3119_v34 = vrot.slane %v3978_v20, 9  ;;  %s3293_s18 = sshll.u32 %s4712_s27, 6 }
  0x21   : > { %605 = vrot.lane.b32.xlu1 %v498_v21, %s3823_s22  ;;  %v525_v32 = vrot.slane %v523_v23, 5  ;;  %v416_v35 = vld [vmem:[%s3907_s16 + $0x38] sm:$0xf]  ;;  %v417_v36 = vld [vmem:[%s3907_s16 + $0x3c] sm:$0x1]  ;;  %v712_v37 = vsel %vm3915_vm5, %v3117_v58, %v711_v5  ;;  %v520_v39 = vor.u32 %v519_v28, %v516_v22  ;;  %v719_v43 = vrot.slane %v657_v24, 5  ;;  %s4639_s20 = scalar_lea.vmem %s4698_s8, %s3293_s18 }
  0x22   : > { %603 = vrot.lane.b32.xlu0 %v484_v16, %s3823_s22  ;;  %v507_v38 = vrot.slane %v506_v26, 4  ;;  %v528_v40 = vshrl.u32 %v416_v35, 16  ;;  %v418_v41 = vld [vmem:[%s3907_s16 + $0x40] sm:$0xf]  ;;  %v419_v42 = vld [vmem:[%s3907_s16 + $0x44] sm:$0x1] }
  0x23   : > { %3458 = vmatpush3.bf16.msra.mxu0 %v3677_v4  ;;  %v531_v44 = vshll.u32 %v416_v35, 16  ;;  %v537_v45 = vshll.u32 %v417_v36, 16  ;;  %v542_v46 = vshrl.u32 %v418_v41, 16  ;;  %v521_v47 = vrot.slane %v520_v39, 4  ;;  %v660_v51 = vld [vmem:[%s3907_s16 + $0x38] sm:$0xe] }
  0x24   : > { %3459 = vmatprep.subr.bf16.mxu0 %v3821_v0  ;;  %v3120_v48 = vrot.slane %v658_v29, 9  ;;  %v530_v49 = vrot.slane %v528_v40, 4  ;;  %v545_v50 = vshll.u32 %v418_v41, 16  ;;  %v723_v52 = vrot.slane %v659_v30, 5  ;;  %v661_v59 = vld [vmem:[%s3907_s16 + $0x3c] sm:$0x1] }
  0x25   : > { %753 = vrot.lane.b32.xlu1 %v716_v31, %s3822_s21  ;;  %v533_v53 = vrot.slane %v531_v44, 5  ;;  %v544_v54 = vrot.slane %v542_v46, 4  ;;  %v551_v55 = vshll.u32 %v419_v42, 16  ;;  %v512_v56 = vsel %vm3937_vm6, %v507_v38, %v511_v27  ;;  %v662_v60 = vld [vmem:[%s3907_s16 + $0x40] sm:$0xe]  ;;  %s3828_s27 = smov 4  }
  0x26   : > { %751 = vrot.lane.b32.xlu0 %v712_v37, %s3822_s21  ;;  %v526_v57 = vsel %vm3937_vm6, %v521_v47, %v525_v32  ;;  %v547_v58 = vrot.slane %v545_v50, 5  ;;  %v539_v62 = vrot.slane %v537_v45, 5  ;;  %v3121_v63 = vrot.slane %v660_v51, 9  ;;  %v663_v1 = vld [vmem:[%s3907_s16 + $0x44] sm:$0x1] }
  0x27   : > { %3460 = vmatpush3.bf16.msra.mxu0 %v3678_v25  ;;  %v534_v61 = vor.u32 %v533_v53, %v530_v49  ;;  %v420_v2 = vld [vmem:[%s3907_s16 + $0x48] sm:$0xf]  ;;  %v553_v4 = vrot.slane %v551_v55, 5  ;;  %v422_v7 = vld [vmem:[%s3907_s16 + $0x50] sm:$0xf]  ;;  %v720_v8 = vsel %vm3915_vm5, %v3119_v34, %v719_v43  ;;  %v724_v9 = vsel %vm3915_vm5, %v3120_v48, %v723_v52 }
  0x28   : > { %3515 = vmatprep.subr.bf16.mxu0 %v3821_v0  ;;  %v548_v3 = vor.u32 %v547_v58, %v544_v54  ;;  %v556_v5 = vshrl.u32 %v420_v2, 16  ;;  %v559_v6 = vshll.u32 %v420_v2, 16  ;;  %v421_v12 = vld [vmem:[%s3907_s16 + $0x4c] sm:$0x1]  ;;  %v423_v13 = vld [vmem:[%s3907_s16 + $0x54] sm:$0x1] }
  0x29   : > { %609 = vrot.lane.b32.xlu1 %v526_v57, %s3823_s22  ;;  %v535_v10 = vrot.slane %v534_v61, 4  ;;  %v570_v14 = vshrl.u32 %v422_v7, 16  ;;  %v573_v18 = vshll.u32 %v422_v7, 16  ;;  %v727_v19 = vrot.slane %v661_v59, 5  ;;  %v4024_v26 = vld [vmem:[%s3907_s16 + $0x48] sm:$0xe] }
  0x2a   : > { %607 = vrot.lane.b32.xlu0 %v512_v56, %s3823_s22  ;;  %v549_v15 = vrot.slane %v548_v3, 4  ;;  %v558_v16 = vrot.slane %v556_v5, 4  ;;  %v561_v17 = vrot.slane %v559_v6, 5  ;;  %v3122_v20 = vrot.slane %v662_v60, 9  ;;  %v4032_v29 = vld [vmem:[%s3907_s16 + $0x4c] sm:$0x1] }
  0x2b   : > { %v731_v21 = vrot.slane %v663_v1, 5  ;;  %v572_v22 = vrot.slane %v570_v14, 4  ;;  %v565_v23 = vshll.u32 %v421_v12, 16  ;;  %v575_v24 = vrot.slane %v573_v18, 5  ;;  %v666_v30 = vld [vmem:[%s3907_s16 + $0x50] sm:$0xe] }
  0x2c   : > { %v579_v25 = vshll.u32 %v423_v13, 16  ;;  %v540_v27 = vsel %vm3937_vm6, %v535_v10, %v539_v62  ;;  %v554_v28 = vsel %vm3937_vm6, %v549_v15, %v553_v4  ;;  %v402_v31 = vld [vmem:[%s3907_s16] sm:$0xf]  ;;  %v562_v32 = vor.u32 %v561_v17, %v558_v16  ;;  %v667_v35 = vld [vmem:[%s3907_s16 + $0x54] sm:$0x1] }
  0x2d   : > { %757 = vrot.lane.b32.xlu1 %v724_v9, %s3822_s21  ;;  %v576_v34 = vor.u32 %v575_v24, %v572_v22  ;;  %v403_v36 = vld [vmem:[%s3907_s16 + $0x4] sm:$0x1]  ;;  %v430_v37 = vshrl.u32 %v402_v31, 16  ;;  %v433_v38 = vshll.u32 %v402_v31, 16  ;;  %v728_v39 = vsel %vm3915_vm5, %v3121_v63, %v727_v19  ;;  %v424_v46 = vld [vmem:[%s3907_s16 + $0x58] sm:$0xf] }
  0x2e   : > { %755 = vrot.lane.b32.xlu0 %v720_v8, %s3822_s21  ;;  %v732_v40 = vsel %vm3915_vm5, %v3122_v20, %v731_v21  ;;  %v439_v41 = vshll.u32 %v403_v36, 16  ;;  %v567_v42 = vrot.slane %v565_v23, 5  ;;  %v581_v43 = vrot.slane %v579_v25, 5  ;;  %v425_v50 = vld [vmem:[%s3907_s16 + $0x5c] sm:$0x1]  ;;  %v3685_v23 = vld [vmem:[%s4692_s2 + $0x28] sm:$0xff]  }
  0x2f   : > { %v3123_v44 = vrot.slane %v4024_v26, 9  ;;  %v735_v45 = vrot.slane %v4032_v29, 5  ;;  %v577_v47 = vrot.slane %v576_v34, 4  ;;  %v3124_v48 = vrot.slane %v666_v30, 9  ;;  %v646_v57 = vld [vmem:[%s3907_s16] sm:$0xe] }
  0x30   : > { %v739_v49 = vrot.slane %v667_v35, 5  ;;  %v584_v51 = vshrl.u32 %v424_v46, 16  ;;  %v563_v52 = vrot.slane %v562_v32, 4  ;;  %v432_v53 = vrot.slane %v430_v37, 4  ;;  %v647_v58 = vld [vmem:[%s3907_s16 + $0x4] sm:$0x1] }
  0x31   : > { %613 = vrot.lane.b32.xlu1 %v554_v28, %s3823_s22  ;;  %v435_v54 = vrot.slane %v433_v38, 5  ;;  %v587_v55 = vshll.u32 %v424_v46, 16  ;;  %v441_v56 = vrot.slane %v439_v41, 5  ;;  %v593_v59 = vshll.u32 %v425_v50, 16  ;;  %v668_v60 = vld [vmem:[%s3907_s16 + $0x58] sm:$0xe] }
  0x32   : > { %611 = vrot.lane.b32.xlu0 %v540_v27, %s3823_s22  ;;  %v378_v61 = vld [vmem:[%s3907_s16 + $0x8] sm:$0xf]  ;;  %v586_v62 = vrot.slane %v584_v51, 4  ;;  %v669_v1 = vld [vmem:[%s3907_s16 + $0x5c] sm:$0x1]  ;;  %v582_v3 = vsel %vm3937_vm6, %v577_v47, %v581_v43  ;;  %v568_v5 = vsel %vm3937_vm6, %v563_v52, %v567_v42  ;;  %v3114_v9 = vrot.slane %v646_v57, 9 }
  0x33   : > { %v589_v63 = vrot.slane %v587_v55, 5  ;;  %391 = vst.msk [vmem:[#allocation2 + $0x4] sm:$0xf] %vm389_vm8, %v378_v61  ;;  %v379_v2 = vld [vmem:[%s3907_s16 + $0x10] sm:$0xf]  ;;  %v436_v6 = vor.u32 %v435_v54, %v432_v53  ;;  %v699_v10 = vrot.slane %v647_v58, 5  ;;  %v740_v15 = vsel %vm3915_vm5, %v3124_v48, %v739_v49 }
  0x34   : > { %392 = vst.msk [vmem:[#allocation2 + $0x8] sm:$0xf] %vm389_vm8, %v379_v2  ;;  %v380_v4 = vld [vmem:[%s3907_s16 + $0x18] sm:$0xf]  ;;  %v381_v7 = vld [vmem:[%s3907_s16 + $0x20] sm:$0xf]  ;;  %v736_v18 = vsel %vm3915_vm5, %v3123_v44, %v735_v45 }
  0x35   : > { %761 = vrot.lane.b32.xlu1 %v732_v40, %s3822_s21  ;;  %393 = vst.msk [vmem:[#allocation2 + $0xc] sm:$0xf] %vm389_vm8, %v380_v4  ;;  %394 = vst.msk [vmem:[#allocation2 + $0x10] sm:$0xf] %vm389_vm8, %v381_v7  ;;  %v382_v8 = vld [vmem:[%s3907_s16 + $0x28] sm:$0xf]  ;;  %v590_v16 = vor.u32 %v589_v63, %v586_v62  ;;  %v700_v24 = vsel %vm3915_vm5, %v3114_v9, %v699_v10 }
  0x36   : > { %759 = vrot.lane.b32.xlu0 %v728_v39, %s3822_s21  ;;  %v3125_v12 = vrot.slane %v668_v60, 9  ;;  %v743_v13 = vrot.slane %v669_v1, 5  ;;  %395 = vst.msk [vmem:[#allocation2 + $0x14] sm:$0xf] %vm389_vm8, %v382_v8  ;;  %v383_v14 = vld [vmem:[%s3907_s16 + $0x30] sm:$0xf] }
  0x37   : > { %396 = vst.msk [vmem:[#allocation2 + $0x18] sm:$0xf] %vm389_vm8, %v383_v14  ;;  %v384_v17 = vld [vmem:[%s3907_s16 + $0x38] sm:$0xf]  ;;  %v437_v19 = vrot.slane %v436_v6, 4  ;;  %v595_v20 = vrot.slane %v593_v59, 5 }
  0x38   : > { %397 = vst.msk [vmem:[#allocation2 + $0x1c] sm:$0xf] %vm389_vm8, %v384_v17  ;;  %v3683_v21 = vld [vmem:[%s4692_s2 + $0x30] sm:$0x3f]   ;;  %v385_v22 = vld [vmem:[%s3907_s16 + $0x40] sm:$0xf]  ;;  %v744_v32 = vsel %vm3915_vm5, %v3125_v12, %v743_v13 }
  0x39   : > { %617 = vrot.lane.b32.xlu1 %v582_v3, %s3823_s22  ;;  %398 = vst.msk [vmem:[#allocation2 + $0x20] sm:$0xf] %vm389_vm8, %v385_v22  ;;  %v591_v25 = vrot.slane %v590_v16, 4  ;;  %v1085_v26 = vsel %vm926_vm2, %v3683_v21, 0  ;;  %v386_v27 = vld [vmem:[%s3907_s16 + $0x48] sm:$0xf]  ;;  %v442_v28 = vsel %vm3937_vm6, %v437_v19, %v441_v56 }
  0x3a   : > { %615 = vrot.lane.b32.xlu0 %v568_v5, %s3823_s22  ;;  %3482 = vmatpush3.bf16.msra.mxu1 %v1085_v26  ;;  %399 = vst.msk [vmem:[#allocation2 + $0x24] sm:$0xf] %vm389_vm8, %v386_v27  ;;  %v387_v29 = vld [vmem:[%s3907_s16 + $0x50] sm:$0xf]  ;;  %v3687_v30 = vld [vmem:[%s4692_s2 + $0x20] sm:$0xff]   ;;  %v3689_v36 = vld [vmem:[%s4692_s2 + $0x18] sm:$0xff]  }
  0x3b   : > { %3483 = vmatprep.subr.bf16.mxu1 %v3821_v0  ;;  %400 = vst.msk [vmem:[#allocation2 + $0x28] sm:$0xf] %vm389_vm8, %v387_v29  ;;  %v377_v31 = vld [vmem:[%s3907_s16] sm:$0xf]  ;;  %v388_v34 = vld [vmem:[%s3907_s16 + $0x58] sm:$0xf]  ;;  %v596_v35 = vsel %vm3937_vm6, %v591_v25, %v595_v20 }
  0x3c   : > { %390 = vst.msk [vmem:[#allocation2] sm:$0xf] %vm389_vm8, %v377_v31  ;;  %401 = vst.msk [vmem:[#allocation2 + $0x2c] sm:$0xf] %vm389_vm8, %v388_v34  ;;  %v3696_v37 = vld [vmem:[%s4692_s2] sm:$0xff]   ;;  %v3681_v51 = vld [vmem:[%s4692_s2 + $0x98] sm:$0xff]  }
  0x3d   : > { %765 = vrot.lane.b32.xlu1 %v740_v15, %s3822_s21  ;;  %v3680_v44 = vld [vmem:[%s4692_s2 + $0xa0] sm:$0x3f]   ;;  %v3684_v52 = vld [vmem:[%s4692_s2 + $0x90] sm:$0xff]   ;;  %v3688_v58 = vld [vmem:[%s4692_s2 + $0x88] sm:$0xff]   ;;  %vm1541_vm15 = vsmask.f32 7938 }
  0x3e   : > { %763 = vrot.lane.b32.xlu0 %v736_v18, %s3822_s21  ;;  %3484 = vmatpush3.bf16.msra.mxu1 %v3685_v23  ;;  %v1268_v48 = vsel %vm926_vm2, %v3680_v44, 0  ;;  %v3690_v59 = vld [vmem:[%s4692_s2 + $0x80] sm:$0xff]   ;;  %v3694_v2 = vld [vmem:[%s4692_s2 + $0x78] sm:$0xff]   ;;  %v3697_v3 = vld [vmem:[%s4692_s2 + $0x70] sm:$0xff]   ;;  %vm1547_vm1 = vsmask.f32 256 }
  0x3f   : > { %3485 = vmatprep.subr.bf16.mxu1 %v3821_v0  ;;  %v3708_v23 = vld [vmem:[%s4694_s4 + $0x78] sm:$0xff]   ;;  %v3711_v25 = vld [vmem:[%s4694_s4 + $0x30] sm:$0xff]   ;;  %v3712_v27 = vld [vmem:[%s4694_s4 + $0x68] sm:$0xff]  }
  0x40   : > { %v3716_v26 = vld [vmem:[%s4694_s4 + $0xb8] sm:$0xff]   ;;  %v3718_v29 = vld [vmem:[%s4694_s4 + $0xb0] sm:$0xff]   ;;  %v3715_v31 = vld [vmem:[%s4694_s4 + $0x20] sm:$0xff]  }
  0x41   : > { %745 = vrot.lane.b32.xlu1 %v700_v24, %s3822_s21  ;;  %v3709_v24 = vld [vmem:[%s4694_s4 + $0x38] sm:$0xff]   ;;  %v3720_v34 = vld [vmem:[%s4694_s4 + $0xa8] sm:$0xff]   ;;  %v3734_v44 = vld [vmem:[%s4694_s4 + $0x80] sm:$0xff]  }
  0x42   : > { %597 = vrot.lane.b32.xlu0 %v442_v28, %s3823_s22  ;;  %3486 = vmatpush3.bf16.msra.mxu1 %v3687_v30  ;;  %v3713_v28 = vld [vmem:[%s4694_s4 + $0x28] sm:$0xff]   ;;  %v3714_v30 = vld [vmem:[%s4694_s4 + $0x60] sm:$0xff]   ;;  %vm4323_vm3 = vmand %vm1540_vm14, %vm1541_vm15  ;;  %vm2271_vm14 = vcmask 1046528   ;;  %vm2423_vm15 = vcmask 293888  }
  0x43   : > { %3487 = vmatprep.subr.bf16.mxu1 %v3821_v0  ;;  %vm4328_vm4 = vmand %vm1546_vm12, %vm1547_vm1 }
  0x45   : > { %767 = vrot.lane.b32.xlu1 %v744_v32, %s3822_s21  ;;  %v3717_v32 = vld [vmem:[%s4694_s4 + $0x58] sm:$0xff]  }
  0x46   : > { %619 = vrot.lane.b32.xlu0 %v596_v35, %s3823_s22  ;;  %3488 = vmatpush3.bf16.msra.mxu1 %v3689_v36  ;;  %v3719_v35 = vld [vmem:[%s4694_s4 + $0x18] sm:$0xff]   ;;  %v3721_v36 = vld [vmem:[%s4694_s4 + $0x50] sm:$0xff]   ;;  %s3826_s22 = smov 92  }
  0x47   : > { %3489 = vmatprep.subr.bf16.mxu1 %v3821_v0 }
  0x4a   : > { %3490 = vmatpush3.bf16.msra.mxu1 %v3692_v11  ;;  %v3722_v11 = vld [vmem:[%s4694_s4 + $0x10] sm:$0xff]  }
  0x4b   : > { %3491 = vmatprep.subr.bf16.mxu1 %v3821_v0 }
  0x4e   : > { %3492 = vmatpush3.bf16.msra.mxu1 %v3693_v33  ;;  %v3723_v33 = vld [vmem:[%s4694_s4 + $0xa0] sm:$0xff]  }
  0x4f   : > { %3493 = vmatprep.subr.bf16.mxu1 %v3821_v0 }
  0x52   : > { %3494 = vmatpush3.bf16.msra.mxu1 %v3696_v37  ;;  %v3726_v37 = vld [vmem:[%s4694_s4 + $0x98] sm:$0xff]  }
  0x53   : > { %3340 = vmatprep.subr.bf16.mxu1 %v3708_v23 }
  0x88   : > { %v748_v38 = vpop.permute.xlu1 %747 }
  0x8c   : > { %v600_v39 = vpop.permute.xlu0 %599  ;;  %v750_v40 = vpop.permute.xlu1 %749 }
  0x8d   : > { %635 = vst.msk [vmem:[#allocation2 + $0x4] sm:$0xf] %vm633_vm9, %v600_v39  ;;  %v3725_v39 = vld [vmem:[%s4694_s4 + $0x8] sm:$0xff]  }
  0x8e   : > { %783 = vst.msk [vmem:[#allocation2 + $0x4] sm:$0xf] %vm781_vm10, %v748_v38  ;;  %v3724_v38 = vld [vmem:[%s4694_s4 + $0x48] sm:$0xff]  }
  0x90   : > { %v602_v41 = vpop.permute.xlu0 %601 }
  0x91   : > { %636 = vst.msk [vmem:[#allocation2 + $0x8] sm:$0xf] %vm633_vm9, %v602_v41  ;;  %v3727_v41 = vld [vmem:[%s4694_s4 + $0x40] sm:$0xff]  }
  0x92   : > { %784 = vst.msk [vmem:[#allocation2 + $0x8] sm:$0xf] %vm781_vm10, %v750_v40  ;;  %v3729_v40 = vld [vmem:[%s4694_s4 + $0x90] sm:$0xff]  }
  0x93   : > { %v606_v42 = vpop.permute.xlu1 %605 }
  0x94   : > { %v604_v43 = vpop.permute.xlu0 %603  ;;  %638 = vst.msk [vmem:[#allocation2 + $0x10] sm:$0xf] %vm633_vm9, %v606_v42  ;;  %v3728_v42 = vld [vmem:[%s4694_s4] sm:$0xff]  }
  0x95   : > { %637 = vst.msk [vmem:[#allocation2 + $0xc] sm:$0xf] %vm633_vm9, %v604_v43  ;;  %v3731_v43 = vld [vmem:[%s4694_s4 + $0x88] sm:$0xff]  }
  0x97   : > { %v754_v45 = vpop.permute.xlu1 %753 }
  0x98   : > { %v752_v46 = vpop.permute.xlu0 %751  ;;  %786 = vst.msk [vmem:[#allocation2 + $0x10] sm:$0xf] %vm781_vm10, %v754_v45 }
  0x99   : > { %785 = vst.msk [vmem:[#allocation2 + $0xc] sm:$0xf] %vm781_vm10, %v752_v46  ;;  %v3679_v47 = vld [vmem:[#allocation2 + $0x4] sm:$0xff]  }
  0x9a   : > { %3462 = vmatmul.mubr.msk.bf16.vlgmr.msra.gmra.mxu0 %vm910_vm11, %v3679_v47 }
  0x9b   : > { %v610_v49 = vpop.permute.xlu1 %609  ;;  %3516 = vmatpush3.bf16.msra.mxu0 %v1268_v48  ;;  %3465 = vmatprep.mubr.msk.bf16.mxu0 %vm3824_vm7, %v3821_v0 }
  0x9c   : > { %v608_v50 = vpop.permute.xlu0 %607  ;;  %640 = vst.msk [vmem:[#allocation2 + $0x18] sm:$0xf] %vm633_vm9, %v610_v49  ;;  %3517 = vmatprep.subr.bf16.mxu0 %v3821_v0 }
  0x9d   : > { %639 = vst.msk [vmem:[#allocation2 + $0x14] sm:$0xf] %vm633_vm9, %v608_v50  ;;  %v4298_v50 = vld [vmem:[%s4696_s6 + $0x8] ss:$0 sps:$4 sm:$0x11]  }
  0x9f   : > { %v758_v53 = vpop.permute.xlu1 %757  ;;  %3518 = vmatpush3.bf16.msra.mxu0 %v3681_v51 }
  0xa0   : > { %v756_v54 = vpop.permute.xlu0 %755  ;;  %788 = vst.msk [vmem:[#allocation2 + $0x18] sm:$0xf] %vm781_vm10, %v758_v53  ;;  %v3682_v55 = vld [vmem:[#allocation2 + $0xc] sm:$0xff]   ;;  %3519 = vmatprep.subr.bf16.mxu0 %v3821_v0 }
  0xa1   : > { %787 = vst.msk [vmem:[#allocation2 + $0x14] sm:$0xf] %vm781_vm10, %v756_v54  ;;  %v3699_v14 = vld [vmem:[#allocation2 + $0x8] sm:$0xff]  }
  0xa2   : > { %3466 = vmatmul.mubr.msk.bf16.gmra.mxu0 %vm910_vm11, %v3682_v55  ;;  %v3700_v15 = vld [vmem:[#allocation2 + $0x8] sm:$0xff]  }
  0xa3   : > { %v614_v56 = vpop.permute.xlu1 %613  ;;  %3520 = vmatpush3.bf16.msra.mxu0 %v3684_v52  ;;  %3469 = vmatprep.mubr.msk.bf16.mxu0 %vm3824_vm7, %v3821_v0 }
  0xa4   : > { %v612_v57 = vpop.permute.xlu0 %611  ;;  %642 = vst.msk [vmem:[#allocation2 + $0x20] sm:$0xf] %vm633_vm9, %v614_v56  ;;  %3521 = vmatprep.subr.bf16.mxu0 %v3821_v0 }
  0xa5   : > { %641 = vst.msk [vmem:[#allocation2 + $0x1c] sm:$0xf] %vm633_vm9, %v612_v57 }
  0xa7   : > { %v762_v60 = vpop.permute.xlu1 %761  ;;  %3522 = vmatpush3.bf16.msra.mxu0 %v3688_v58 }
  0xa8   : > { %v760_v61 = vpop.permute.xlu0 %759  ;;  %790 = vst.msk [vmem:[#allocation2 + $0x20] sm:$0xf] %vm781_vm10, %v762_v60  ;;  %v3686_v62 = vld [vmem:[#allocation2 + $0x14] sm:$0xff]   ;;  %3523 = vmatprep.subr.bf16.mxu0 %v3821_v0 }
  0xa9   : > { %789 = vst.msk [vmem:[#allocation2 + $0x1c] sm:$0xf] %vm781_vm10, %v760_v61  ;;  %v3701_v16 = vld [vmem:[#allocation2 + $0x10] sm:$0xff]  }
  0xaa   : > { %3470 = vmatmul.mubr.msk.bf16.gmra.mxu0 %vm910_vm11, %v3686_v62  ;;  %v3702_v17 = vld [vmem:[#allocation2 + $0x10] sm:$0xff]  }
  0xab   : > { %v618_v63 = vpop.permute.xlu1 %617  ;;  %3473 = vmatprep.mubr.msk.bf16.mxu0 %vm3824_vm7, %v3821_v0  ;;  %3524 = vmatpush3.bf16.msra.mxu0 %v3690_v59 }
  0xac   : > { %v616_v1 = vpop.permute.xlu0 %615  ;;  %644 = vst.msk [vmem:[#allocation2 + $0x28] sm:$0xf] %vm633_vm9, %v618_v63  ;;  %3525 = vmatprep.subr.bf16.mxu0 %v3821_v0 }
  0xad   : > { %643 = vst.msk [vmem:[#allocation2 + $0x24] sm:$0xf] %vm633_vm9, %v616_v1 }
  0xaf   : > { %v766_v4 = vpop.permute.xlu1 %765  ;;  %3526 = vmatpush3.bf16.msra.mxu0 %v3694_v2 }
  0xb0   : > { %v764_v5 = vpop.permute.xlu0 %763  ;;  %792 = vst.msk [vmem:[#allocation2 + $0x28] sm:$0xf] %vm781_vm10, %v766_v4  ;;  %v3691_v6 = vld [vmem:[#allocation2 + $0x1c] sm:$0xff]   ;;  %3527 = vmatprep.subr.bf16.mxu0 %v3821_v0 }
  0xb1   : > { %791 = vst.msk [vmem:[#allocation2 + $0x24] sm:$0xf] %vm781_vm10, %v764_v5  ;;  %v3703_v18 = vld [vmem:[#allocation2 + $0x18] sm:$0xff]  }
  0xb2   : > { %3474 = vmatmul.mubr.msk.bf16.gmra.mxu0 %vm910_vm11, %v3691_v6  ;;  %v3704_v19 = vld [vmem:[#allocation2 + $0x18] sm:$0xff]  }
  0xb3   : > { %v746_v7 = vpop.permute.xlu1 %745  ;;  %3477 = vmatprep.mubr.msk.bf16.mxu0 %vm3824_vm7, %v3821_v0  ;;  %3528 = vmatpush3.bf16.msra.mxu0 %v3697_v3 }
  0xb4   : > { %v598_v8 = vpop.permute.xlu0 %597  ;;  %3549 = vmatprep.subr.bf16.mxu0 %v3716_v26 }
  0xb5   : > { %634 = vst.msk [vmem:[#allocation2] sm:$0xf] %vm633_vm9, %v598_v8  ;;  %v4317_v8 = vld [vmem:[%s4693_s3] ss:$0 sm:$0xff] }
  0xb6   : > { %782 = vst.msk [vmem:[#allocation2] sm:$0xf] %vm781_vm10, %v746_v7 }
  0xb7   : > { %v768_v9 = vpop.permute.xlu1 %767 }
  0xb8   : > { %v620_v10 = vpop.permute.xlu0 %619  ;;  %v3695_v12 = vld [vmem:[#allocation2 + $0x24] sm:$0xff]  }
  0xb9   : > { %645 = vst.msk [vmem:[#allocation2 + $0x2c] sm:$0xf] %vm633_vm9, %v620_v10  ;;  %v3705_v20 = vld [vmem:[#allocation2 + $0x20] sm:$0xff]  }
  0xba   : > { %793 = vst.msk [vmem:[#allocation2 + $0x2c] sm:$0xf] %vm781_vm10, %v768_v9  ;;  %3478 = vmatmul.mubr.msk.bf16.gmra.mxu0 %vm910_vm11, %v3695_v12  ;;  %v3706_v21 = vld [vmem:[#allocation2 + $0x20] sm:$0xff]  }
  0xbb   : > { %3529 = vmatprep.mubr.msk.bf16.mxu0 %vm3824_vm7, %v3821_v0 }
  0xbd   : > { %v3698_v13 = vld [vmem:[#allocation2] sm:$0xff]  }
  0xbe   : > { %3496 = vmatmul.mubr.msk.bf16.vlgmr.msra.gmra.mxu1 %vm910_vm11, %v3698_v13 }
  0xbf   : > { %3499 = vmatprep.mubr.msk.bf16.mxu1 %vm3824_vm7, %v3821_v0  ;;  %3341 = vmatpush3.bf16.msra.mxu1 %v3709_v24 }
  0xc1   : > { %v3707_v22 = vld [vmem:[#allocation2 + $0x28] sm:$0xff]  }
  0xc2   : > { %3530 = vmatmul.mubr.msk.bf16.vlgmr.msra.gmra.mxu0 %vm910_vm11, %v3699_v14 }
  0xc3   : > { %3533 = vmatprep.mubr.msk.bf16.mxu0 %vm3824_vm7, %v3821_v0  ;;  %3550 = vmatpush3.bf16.msra.mxu0 %v3716_v26 }
  0xc4   : > { %3551 = vmatprep.subr.bf16.mxu0 %v3718_v29 }
  0xc6   : > { %3500 = vmatmul.mubr.msk.bf16.gmra.mxu1 %vm910_vm11, %v3700_v15 }
  0xc7   : > { %3503 = vmatprep.mubr.msk.bf16.mxu1 %vm3824_vm7, %v3821_v0  ;;  %3552 = vmatpush3.bf16.msra.mxu0 %v3718_v29 }
  0xc8   : > { %3553 = vmatprep.subr.bf16.mxu0 %v3720_v34 }
  0xca   : > { %3534 = vmatmul.mubr.msk.bf16.gmra.mxu0 %vm910_vm11, %v3701_v16 }
  0xcb   : > { %3537 = vmatprep.mubr.msk.bf16.mxu0 %vm3824_vm7, %v3821_v0  ;;  %3554 = vmatpush3.bf16.msra.mxu0 %v3720_v34 }
  0xcc   : > { %3555 = vmatprep.subr.bf16.mxu0 %v3723_v33 }
  0xce   : > { %3504 = vmatmul.mubr.msk.bf16.gmra.mxu1 %vm910_vm11, %v3702_v17 }
  0xcf   : > { %3507 = vmatprep.mubr.msk.bf16.mxu1 %vm3824_vm7, %v3821_v0  ;;  %3556 = vmatpush3.bf16.msra.mxu0 %v3723_v33  ;;  %v1543_v33 = vld [vmem:[#allocation3] sm:$0xf] }
  0xd0   : > { %3557 = vmatprep.subr.bf16.mxu0 %v3726_v37 }
  0xd2   : > { %3538 = vmatmul.mubr.msk.bf16.gmra.mxu0 %vm910_vm11, %v3703_v18 }
  0xd3   : > { %3541 = vmatprep.mubr.msk.bf16.mxu0 %vm3824_vm7, %v3821_v0  ;;  %3558 = vmatpush3.bf16.msra.mxu0 %v3726_v37 }
  0xd4   : > { %3559 = vmatprep.subr.bf16.mxu0 %v3729_v40 }
  0xd6   : > { %3508 = vmatmul.mubr.msk.bf16.gmra.mxu1 %vm910_vm11, %v3704_v19 }
  0xd7   : > { %3511 = vmatprep.mubr.msk.bf16.mxu1 %vm3824_vm7, %v3821_v0  ;;  %3560 = vmatpush3.bf16.msra.mxu0 %v3729_v40 }
  0xd8   : > { %3561 = vmatprep.subr.bf16.mxu0 %v3731_v43 }
  0xda   : > { %3542 = vmatmul.mubr.msk.bf16.gmra.mxu0 %vm910_vm11, %v3705_v20 }
  0xdb   : > { %3545 = vmatprep.mubr.msk.bf16.mxu0 %vm3824_vm7, %v3821_v0  ;;  %v3710_v0 = vld [vmem:[%s4694_s4 + $0x70] sm:$0xff]   ;;  %3562 = vmatpush3.bf16.msra.mxu0 %v3731_v43 }
  0xdc   : > { %3342 = vmatprep.subr.bf16.mxu1 %v3710_v0  ;;  %3563 = vmatprep.subr.bf16.mxu0 %v3734_v44 }
  0xdd   : > { %3343 = vmatpush3.bf16.msra.mxu1 %v3711_v25 }
  0xde   : > { %3512 = vmatmul.mubr.msk.bf16.gmra.mxu1 %vm910_vm11, %v3706_v21  ;;  %3344 = vmatprep.subr.bf16.mxu1 %v3712_v27 }
  0xdf   : > { %3564 = vmatpush3.bf16.msra.mxu0 %v3734_v44 }
  0xe1   : > { %3345 = vmatpush3.bf16.msra.mxu1 %v3713_v28 }
  0xe2   : > { %3546 = vmatmul.mubr.msk.bf16.gmra.mxu0 %vm910_vm11, %v3707_v22  ;;  %3346 = vmatprep.subr.bf16.mxu1 %v3714_v30 }
  0xe5   : > { %3347 = vmatpush3.bf16.msra.mxu1 %v3715_v31 }
  0xe6   : > { %3348 = vmatprep.subr.bf16.mxu1 %v3717_v32 }
  0xe9   : > { %3349 = vmatpush3.bf16.msra.mxu1 %v3719_v35 }
  0xea   : > { %3350 = vmatprep.subr.bf16.mxu1 %v3721_v36 }
  0xed   : > { %3351 = vmatpush3.bf16.msra.mxu1 %v3722_v11 }
  0xee   : > { %3352 = vmatprep.subr.bf16.mxu1 %v3724_v38 }
  0xf1   : > { %3353 = vmatpush3.bf16.msra.mxu1 %v3725_v39 }
  0xf2   : > { %3354 = vmatprep.subr.bf16.mxu1 %v3727_v41  ;;  %v1549_v41 = vld [vmem:[#allocation3 + $0x4] sm:$0x1] }
  0xf5   : > { %3355 = vmatpush3.bf16.msra.mxu1 %v3728_v42 }
  0xf6   : > { %3635 = vmatprep.subr.msk.bf16.mxu1 %vm1546_vm12, %v4298_v50 }
 0x15a   : > { %v964_v45 = vpop.f32.mrf.mxu0 }
 0x15c   : > { %v3463_v46 = vpop.f32.mrf.mxu0 }
 0x15e   : > { %v967_v47 = vpop.f32.mrf.mxu0 }
 0x160   : > { %v3464_v48 = vpop.f32.mrf.mxu0 }
 0x162   : > { %v972_v49 = vpop.f32.mrf.mxu0 }
 0x164   : > { %v3467_v51 = vpop.f32.mrf.mxu0 }
 0x166   : > { %v975_v52 = vpop.f32.mrf.mxu0 }
 0x168   : > { %v3468_v53 = vpop.f32.mrf.mxu0 }
 0x16a   : > { %v4302_v54 = vpop.f32.mrf.mxu0 }
 0x16c   : > { %v3471_v55 = vpop.f32.mrf.mxu0 }
 0x16e   : > { %v4304_v56 = vpop.f32.mrf.mxu0 }
 0x170   : > { %v3472_v57 = vpop.f32.mrf.mxu0 }
 0x172   : > { %v4306_v58 = vpop.f32.mrf.mxu0 }
 0x174   : > { %v3475_v59 = vpop.f32.mrf.mxu0 }
 0x176   : > { %v4308_v60 = vpop.f32.mrf.mxu0 }
 0x178   : > { %v3476_v61 = vpop.f32.mrf.mxu0 }
 0x179   : > { %v1552_v61 = vld [vmem:[#allocation3 + $0x8] sm:$0xf] }
 0x17a   : > { %v4310_v62 = vpop.f32.mrf.mxu0 }
 0x17c   : > { %v3479_v63 = vpop.f32.mrf.mxu0 }
 0x17e   : > { %v4312_v1 = vpop.f32.mrf.mxu0  ;;  %v1121_v2 = vpop.f32.mrf.mxu1 }
 0x17f   : > { %v1122_v5 = vadd.f32 %v1121_v2, %v964_v45 }
 0x180   : > { %v3480_v3 = vpop.f32.mrf.mxu0  ;;  %v3497_v4 = vpop.f32.mrf.mxu1 }
 0x181   : > { %v1555_v4 = vld [vmem:[#allocation3 + $0xc] sm:$0x1] }
 0x182   : > { %v1124_v6 = vpop.f32.mrf.mxu1  ;;  %v1304_v7 = vpop.f32.mrf.mxu0 }
 0x183   : > { %v1343_v9 = vadd.f32 %v1304_v7, %v1122_v5  ;;  %v1125_v13 = vadd.f32 %v1124_v6, %v967_v47 }
 0x184   : > { %v3498_v10 = vpop.f32.mrf.mxu1  ;;  %v3531_v12 = vpop.f32.mrf.mxu0 }
 0x185   : > { %v1360_v14 = vadd.f32 %v4317_v8, %v1343_v9 }
 0x186   : > { %v1129_v15 = vpop.f32.mrf.mxu1  ;;  %v1307_v16 = vpop.f32.mrf.mxu0 }
 0x187   : > { %vm1370_vm13 = vcmp.ge.f32.partialorder %v1360_v14, 0.0  ;;  %v1380_v17 = vmul.f32 0.1, %v1360_v14  ;;  %v1344_v18 = vadd.f32 %v1307_v16, %v1125_v13  ;;  %v1130_v22 = vadd.f32 %v1129_v15, %v972_v49 }
 0x188   : > { %v3501_v19 = vpop.f32.mrf.mxu1  ;;  %v3532_v20 = vpop.f32.mrf.mxu0 }
 0x189   : > { %v1390_v21 = vsel %vm1370_vm13, %v1360_v14, %v1380_v17  ;;  %v1361_v23 = vadd.f32 %v4317_v8, %v1344_v18  ;;  %v1558_v20 = vld [vmem:[#allocation3 + $0x10] sm:$0xf]  ;;  %vm2512_vm13 = vcmask 146432  }
 0x18a   : > { %v3294_v24 = vpack.c.bf16 %v1390_v21, %v1390_v21  ;;  %v1132_v0 = vpop.f32.mrf.mxu1  ;;  %v1312_v25 = vpop.f32.mrf.mxu0 }
 0x18b   : > { %vm1371_vm0 = vcmp.ge.f32.partialorder %v1361_v23, 0.0  ;;  %v1381_v26 = vmul.f32 0.1, %v1361_v23  ;;  %v1345_v27 = vadd.f32 %v1312_v25, %v1130_v22  ;;  %v1133_v32 = vadd.f32 %v1132_v0, %v975_v52 }
 0x18c   : > { %v1441_v28 = vshrl.u32 %v3294_v24, 16  ;;  %v3502_v29 = vpop.f32.mrf.mxu1  ;;  %v3535_v30 = vpop.f32.mrf.mxu0  ;;  %v1444_v36 = vshll.u32 %v3294_v24, 16  ;;  %v1561_v24 = vld [vmem:[#allocation3 + $0x14] sm:$0x1] }
 0x18d   : > { %v1391_v31 = vsel %vm1371_vm0, %v1361_v23, %v1381_v26  ;;  %v1362_v34 = vadd.f32 %v4317_v8, %v1345_v27 }
 0x18e   : > { %v1443_v35 = vrot.slane %v1441_v28, 7  ;;  %v3295_v37 = vpack.c.bf16 %v1391_v31, %v1391_v31  ;;  %v1137_v38 = vpop.f32.mrf.mxu1  ;;  %v1315_v39 = vpop.f32.mrf.mxu0  ;;  %v1564_v31 = vld [vmem:[#allocation3 + $0x18] sm:$0xf] }
 0x18f   : > { %vm1372_vm5 = vcmp.ge.f32.partialorder %v1362_v34, 0.0  ;;  %v1382_v42 = vmul.f32 0.1, %v1362_v34  ;;  %v1346_v43 = vadd.f32 %v1315_v39, %v1133_v32  ;;  %v1138_v52 = vadd.f32 %v1137_v38, %v4302_v54  ;;  %v1567_v32 = vld [vmem:[#allocation3 + $0x1c] sm:$0x1] }
 0x190   : > { %v1446_v44 = vor.u32 %v1444_v36, %v1443_v35  ;;  %v1447_v45 = vrot.slane %v1443_v35, 4  ;;  %v1449_v46 = vshrl.u32 %v3295_v37, 16  ;;  %v3505_v47 = vpop.f32.mrf.mxu1  ;;  %v3536_v48 = vpop.f32.mrf.mxu0  ;;  %v1452_v49 = vshll.u32 %v3295_v37, 16 }
 0x191   : > { %v1392_v51 = vsel %vm1372_vm5, %v1362_v34, %v1382_v42  ;;  %v1363_v53 = vadd.f32 %v4317_v8, %v1346_v43 }
 0x192   : > { %v1544_v55 = vsel %vm4323_vm3, %v1446_v44, %v1543_v33  ;;  %v1550_v57 = vsel %vm4328_vm4, %v1447_v45, %v1549_v41  ;;  %v1451_v59 = vrot.slane %v1449_v46, 7  ;;  %v3296_v63 = vpack.c.bf16 %v1392_v51, %v1392_v51  ;;  %v1140_v2 = vpop.f32.mrf.mxu1  ;;  %v1320_v3 = vpop.f32.mrf.mxu0 }
 0x193   : > { %1545 = vst [vmem:[#allocation3] sm:$0xf] %v1544_v55  ;;  %1551 = vst [vmem:[#allocation3 + $0x4] sm:$0x1] %v1550_v57  ;;  %vm1373_vm6 = vcmp.ge.f32.partialorder %v1363_v53, 0.0  ;;  %v1347_v6 = vadd.f32 %v1320_v3, %v1138_v52  ;;  %v1141_v15 = vadd.f32 %v1140_v2, %v4304_v56 }
 0x194   : > { %v1383_v5 = vmul.f32 0.1, %v1363_v53  ;;  %v1454_v54 = vor.u32 %v1452_v49, %v1451_v59  ;;  %v1455_v7 = vrot.slane %v1451_v59, 4  ;;  %v1457_v9 = vshrl.u32 %v3296_v63, 16  ;;  %v3506_v10 = vpop.f32.mrf.mxu1  ;;  %v3539_v12 = vpop.f32.mrf.mxu0 }
 0x195   : > { %v1460_v13 = vshll.u32 %v3296_v63, 16  ;;  %v1364_v16 = vadd.f32 %v4317_v8, %v1347_v6  ;;  %v1570_v10 = vld [vmem:[#allocation3 + $0x20] sm:$0xf]  ;;  %v1573_v12 = vld [vmem:[#allocation3 + $0x24] sm:$0x1] }
 0x196   : > { %v1393_v14 = vsel %vm1373_vm6, %v1363_v53, %v1383_v5  ;;  %v1553_v17 = vsel %vm4323_vm3, %v1454_v54, %v1552_v61  ;;  %v1556_v18 = vsel %vm4328_vm4, %v1455_v7, %v1555_v4  ;;  %v1459_v19 = vrot.slane %v1457_v9, 7  ;;  %v1145_v22 = vpop.f32.mrf.mxu1  ;;  %v1323_v23 = vpop.f32.mrf.mxu0 }
 0x197   : > { %v3297_v21 = vpack.c.bf16 %v1393_v14, %v1393_v14  ;;  %1554 = vst [vmem:[#allocation3 + $0x8] sm:$0xf] %v1553_v17  ;;  %1557 = vst [vmem:[#allocation3 + $0xc] sm:$0x1] %v1556_v18  ;;  %vm1374_vm7 = vcmp.ge.f32.partialorder %v1364_v16, 0.0  ;;  %v1348_v25 = vadd.f32 %v1323_v23, %v1141_v15  ;;  %v1146_v35 = vadd.f32 %v1145_v22, %v4306_v58 }
 0x198   : > { %v1384_v0 = vmul.f32 0.1, %v1364_v16  ;;  %v1462_v56 = vor.u32 %v1460_v13, %v1459_v19  ;;  %v1463_v26 = vrot.slane %v1459_v19, 4  ;;  %v3509_v28 = vpop.f32.mrf.mxu1  ;;  %v3540_v29 = vpop.f32.mrf.mxu0  ;;  %v3825_v53 = vmov 0  }
 0x199   : > { %v1465_v27 = vshrl.u32 %v3297_v21, 16  ;;  %v1468_v30 = vshll.u32 %v3297_v21, 16  ;;  %v1365_v36 = vadd.f32 %v4317_v8, %v1348_v25 }
 0x19a   : > { %v1394_v34 = vsel %vm1374_vm7, %v1364_v16, %v1384_v0  ;;  %v1606_v33 = vld [vmem:[#allocation3] sm:$0x1]  ;;  %v1636_v37 = vld [vmem:[#allocation3 + $0x4] sm:$0xf]  ;;  %v1559_v38 = vsel %vm4323_vm3, %v1462_v56, %v1558_v20  ;;  %v1562_v39 = vsel %vm4328_vm4, %v1463_v26, %v1561_v24  ;;  %v1148_v43 = vpop.f32.mrf.mxu1  ;;  %v1328_v44 = vpop.f32.mrf.mxu0  ;;  %vm2678_vm7 = vcmask 1041408  }
 0x19b   : > { %v1467_v41 = vrot.slane %v1465_v27, 7  ;;  %v3298_v42 = vpack.c.bf16 %v1394_v34, %v1394_v34  ;;  %v1607_v45 = vsel %vm4328_vm4, 0, %v1606_v33  ;;  %v1637_v58 = vsel %vm4323_vm3, 0, %v1636_v37  ;;  %1560 = vst [vmem:[#allocation3 + $0x10] sm:$0xf] %v1559_v38 }
 0x19c   : > { %1563 = vst [vmem:[#allocation3 + $0x14] sm:$0x1] %v1562_v39  ;;  %vm1375_vm8 = vcmp.ge.f32.partialorder %v1365_v36, 0.0  ;;  %v1385_v46 = vmul.f32 0.1, %v1365_v36  ;;  %v3510_v51 = vpop.f32.mrf.mxu1  ;;  %v3543_v52 = vpop.f32.mrf.mxu0  ;;  %v1349_v59 = vadd.f32 %v1328_v44, %v1146_v35  ;;  %v1149_v13 = vadd.f32 %v1148_v43, %v4308_v60 }
 0x19d   : > { %1608 = vst [vmem:[#allocation3] sm:$0x1] %v1607_v45  ;;  %1638 = vst [vmem:[#allocation3 + $0x4] sm:$0xf] %v1637_v58  ;;  %v1470_v47 = vor.u32 %v1468_v30, %v1467_v41  ;;  %v1471_v48 = vrot.slane %v1467_v41, 4  ;;  %v1473_v49 = vshrl.u32 %v3298_v42, 16 }
 0x19e   : > { %1670 = vst [vmem:[#allocation3] sm:$0xf] %v3825_v53  ;;  %1671 = vst [vmem:[#allocation3 + $0x4] sm:$0xf] %v3825_v53  ;;  %v1476_v55 = vshll.u32 %v3298_v42, 16  ;;  %v1395_v57 = vsel %vm1375_vm8, %v1365_v36, %v1385_v46  ;;  %v1153_v6 = vpop.f32.mrf.mxu1  ;;  %v1331_v54 = vpop.f32.mrf.mxu0  ;;  %v1366_v14 = vadd.f32 %v4317_v8, %v1349_v59 }
 0x19f   : > { %v1609_v61 = vld [vmem:[#allocation3 + $0x8] sm:$0x1]  ;;  %v1639_v63 = vld [vmem:[#allocation3 + $0xc] sm:$0xf]  ;;  %v1565_v2 = vsel %vm4323_vm3, %v1470_v47, %v1564_v31  ;;  %v1568_v3 = vsel %vm4328_vm4, %v1471_v48, %v1567_v32  ;;  %v1475_v4 = vrot.slane %v1473_v49, 7  ;;  %v3299_v5 = vpack.c.bf16 %v1395_v57, %v1395_v57 }
 0x1a0   : > { %v1610_v7 = vsel %vm4328_vm4, 0, %v1609_v61  ;;  %v1640_v9 = vsel %vm4323_vm3, 0, %v1639_v63  ;;  %1566 = vst [vmem:[#allocation3 + $0x18] sm:$0xf] %v1565_v2  ;;  %1569 = vst [vmem:[#allocation3 + $0x1c] sm:$0x1] %v1568_v3  ;;  %v3513_v18 = vpop.f32.mrf.mxu1  ;;  %v3544_v19 = vpop.f32.mrf.mxu0  ;;  %v1154_v21 = vadd.f32 %v1153_v6, %v4310_v62  ;;  %v1350_v22 = vadd.f32 %v1331_v54, %v1149_v13 }
 0x1a1   : > { %1611 = vst [vmem:[#allocation3 + $0x8] sm:$0x1] %v1610_v7  ;;  %1641 = vst [vmem:[#allocation3 + $0xc] sm:$0xf] %v1640_v9  ;;  %v1478_v15 = vor.u32 %v1476_v55, %v1475_v4  ;;  %v1479_v16 = vrot.slane %v1475_v4, 4  ;;  %v1481_v17 = vshrl.u32 %v3299_v5, 16 }
 0x1a2   : > { %vm1376_vm9 = vcmp.ge.f32.partialorder %v1366_v14, 0.0  ;;  %v1386_v20 = vmul.f32 0.1, %v1366_v14  ;;  %v1612_v23 = vld [vmem:[#allocation3 + $0x10] sm:$0x1]  ;;  %v1484_v56 = vshll.u32 %v3299_v5, 16  ;;  %v1156_v26 = vpop.f32.mrf.mxu1  ;;  %v1336_v27 = vpop.f32.mrf.mxu0  ;;  %v1367_v32 = vadd.f32 %v4317_v8, %v1350_v22 }
 0x1a3   : > { %v1642_v24 = vld [vmem:[#allocation3 + $0x14] sm:$0xf]  ;;  %v1571_v0 = vsel %vm4323_vm3, %v1478_v15, %v1570_v10  ;;  %v1574_v60 = vsel %vm4328_vm4, %v1479_v16, %v1573_v12  ;;  %v1483_v25 = vrot.slane %v1481_v17, 7  ;;  %v1613_v28 = vsel %vm4328_vm4, 0, %v1612_v23  ;;  %v1576_v62 = vld [vmem:[#allocation3 + $0x28] sm:$0xf] }
 0x1a4   : > { %v1643_v29 = vsel %vm4323_vm3, 0, %v1642_v24  ;;  %1572 = vst [vmem:[#allocation3 + $0x20] sm:$0xf] %v1571_v0  ;;  %1575 = vst [vmem:[#allocation3 + $0x24] sm:$0x1] %v1574_v60  ;;  %v1396_v31 = vsel %vm1376_vm9, %v1366_v14, %v1386_v20  ;;  %v3514_v33 = vpop.f32.mrf.mxu1  ;;  %v3547_v37 = vpop.f32.mrf.mxu0  ;;  %vm1377_vm10 = vcmp.ge.f32.partialorder %v1367_v32, 0.0  ;;  %v1157_v39 = vadd.f32 %v1156_v26, %v4312_v1 }
 0x1a5   : > { %v1579_v30 = vld [vmem:[#allocation3 + $0x2c] sm:$0x1]  ;;  %1614 = vst [vmem:[#allocation3 + $0x10] sm:$0x1] %v1613_v28  ;;  %1644 = vst [vmem:[#allocation3 + $0x14] sm:$0xf] %v1643_v29  ;;  %v1486_v34 = vor.u32 %v1484_v56, %v1483_v25  ;;  %v3300_v36 = vpack.c.bf16 %v1396_v31, %v1396_v31  ;;  %v1351_v41 = vadd.f32 %v1336_v27, %v1154_v21 }
 0x1a6   : > { %v1487_v35 = vrot.slane %v1483_v25, 4  ;;  %v1387_v38 = vmul.f32 0.1, %v1367_v32  ;;  %v3732_v42 = vld [vmem:[#allocation3] sm:$0xff]   ;;  %v1339_v48 = vpop.f32.mrf.mxu0  ;;  %v1582_v1 = vld [vmem:[#allocation3 + $0x30] sm:$0xf] }
 0x1a7   : > { %v1615_v43 = vld [vmem:[#allocation3 + $0x18] sm:$0x1]  ;;  %v1645_v44 = vld [vmem:[#allocation3 + $0x1c] sm:$0xf]  ;;  %v1577_v45 = vsel %vm4323_vm3, %v1486_v34, %v1576_v62  ;;  %v1489_v46 = vshrl.u32 %v3300_v36, 16  ;;  %v1492_v47 = vshll.u32 %v3300_v36, 16  ;;  %v1368_v55 = vadd.f32 %v4317_v8, %v1351_v41 }
 0x1a8   : > { %v1580_v58 = vsel %vm4328_vm4, %v1487_v35, %v1579_v30  ;;  %v1616_v49 = vsel %vm4328_vm4, 0, %v1615_v43  ;;  %v1646_v51 = vsel %vm4323_vm3, 0, %v1645_v44  ;;  %1578 = vst [vmem:[#allocation3 + $0x28] sm:$0xf] %v1577_v45  ;;  %v1397_v52 = vsel %vm1377_vm10, %v1367_v32, %v1387_v38  ;;  %v3548_v63 = vpop.f32.mrf.mxu0  ;;  %v3730_v2 = vld [vmem:[#allocation3 + $0x8] sm:$0xff]  }
 0x1a9   : > { %1581 = vst [vmem:[#allocation3 + $0x2c] sm:$0x1] %v1580_v58  ;;  %1617 = vst [vmem:[#allocation3 + $0x18] sm:$0x1] %v1616_v49  ;;  %v1491_v57 = vrot.slane %v1489_v46, 7  ;;  %v3301_v59 = vpack.c.bf16 %v1397_v52, %v1397_v52  ;;  %v1352_v61 = vadd.f32 %v1339_v48, %v1157_v39  ;;  %vm1378_vm11 = vcmp.ge.f32.partialorder %v1368_v55, 0.0  ;;  %2093 = vmatprep.mubr.bf16.mxu1 %v3730_v2 }
 0x1aa   : > { %1647 = vst [vmem:[#allocation3 + $0x1c] sm:$0xf] %v1646_v51  ;;  %v1585_v3 = vld [vmem:[#allocation3 + $0x34] sm:$0x1]  ;;  %v1388_v4 = vmul.f32 0.1, %v1368_v55  ;;  %2094 = vmatmul.mubr.bf16.vlgmr.msra.gmra.mxu1 %v3732_v42 }
 0x1ab   : > { %v2527_v5 = vsel %vm1546_vm12, %v4298_v50, 0  ;;  %v1618_v6 = vld [vmem:[#allocation3 + $0x20] sm:$0x1]  ;;  %v1648_v54 = vld [vmem:[#allocation3 + $0x24] sm:$0xf]  ;;  %v1494_v7 = vor.u32 %v1492_v47, %v1491_v57  ;;  %v1495_v9 = vrot.slane %v1491_v57, 4  ;;  %v1369_v12 = vadd.f32 %v4317_v8, %v1352_v61 }
 0x1ac   : > { %v1497_v10 = vshrl.u32 %v3301_v59, 16  ;;  %v1619_v13 = vsel %vm4328_vm4, 0, %v1618_v6  ;;  %v1649_v14 = vsel %vm4323_vm3, 0, %v1648_v54  ;;  %v1500_v15 = vshll.u32 %v3301_v59, 16  ;;  %v1588_v16 = vld [vmem:[#allocation3 + $0x38] sm:$0xf]  ;;  %3582 = vmatpush3.bf16.msra.mxu1 %v2527_v5 }
 0x1ad   : > { %v1591_v17 = vld [vmem:[#allocation3 + $0x3c] sm:$0x1]  ;;  %v1398_v18 = vsel %vm1378_vm11, %v1368_v55, %v1388_v4  ;;  %v3733_v50 = vld [vmem:[#allocation3 + $0x10] sm:$0xff]   ;;  %1620 = vst [vmem:[#allocation3 + $0x20] sm:$0x1] %v1619_v13  ;;  %v1583_v19 = vsel %vm4323_vm3, %v1494_v7, %v1582_v1  ;;  %v1586_v8 = vsel %vm4328_vm4, %v1495_v9, %v1585_v3  ;;  %vm1379_vm12 = vcmp.ge.f32.partialorder %v1369_v12, 0.0 }
 0x1ae   : > { %1650 = vst [vmem:[#allocation3 + $0x24] sm:$0xf] %v1649_v14  ;;  %v1499_v20 = vrot.slane %v1497_v10, 7  ;;  %v3302_v21 = vpack.c.bf16 %v1398_v18, %v1398_v18  ;;  %v3735_v22 = vld [vmem:[#allocation3 + $0x10] sm:$0xff]   ;;  %1584 = vst [vmem:[#allocation3 + $0x30] sm:$0xf] %v1583_v19  ;;  %2101 = vmatprep.mubr.bf16.mxu1 %v3733_v50 }
 0x1af   : > { %1587 = vst [vmem:[#allocation3 + $0x34] sm:$0x1] %v1586_v8  ;;  %v1389_v23 = vmul.f32 0.1, %v1369_v12  ;;  %v1621_v24 = vld [vmem:[#allocation3 + $0x28] sm:$0x1]  ;;  %3565 = vmatprep.mubr.bf16.mxu0 %v3735_v22 }
 0x1b0   : > { %v1651_v0 = vld [vmem:[#allocation3 + $0x2c] sm:$0xf]  ;;  %v1502_v60 = vor.u32 %v1500_v15, %v1499_v20  ;;  %v1503_v25 = vrot.slane %v1499_v20, 4  ;;  %v1505_v56 = vshrl.u32 %v3302_v21, 16  ;;  %v1622_v26 = vsel %vm4328_vm4, 0, %v1621_v24  ;;  %v3741_v5 = vld [vmem:[#allocation3 + $0x10] sm:$0xff]  }
 0x1b1   : > { %v1652_v27 = vsel %vm4323_vm3, 0, %v1651_v0  ;;  %v1508_v28 = vshll.u32 %v3302_v21, 16  ;;  %v1594_v29 = vld [vmem:[#allocation3 + $0x40] sm:$0xf]  ;;  %v1597_v62 = vld [vmem:[#allocation3 + $0x44] sm:$0x1]  ;;  %v1399_v30 = vsel %vm1379_vm12, %v1369_v12, %v1389_v23 }
 0x1b2   : > { %v3736_v31 = vld [vmem:[#allocation3 + $0x18] sm:$0xff]   ;;  %1623 = vst [vmem:[#allocation3 + $0x28] sm:$0x1] %v1622_v26  ;;  %1653 = vst [vmem:[#allocation3 + $0x2c] sm:$0xf] %v1652_v27  ;;  %v1589_v32 = vsel %vm4323_vm3, %v1502_v60, %v1588_v16  ;;  %v1592_v34 = vsel %vm4328_vm4, %v1503_v25, %v1591_v17  ;;  %v1507_v35 = vrot.slane %v1505_v56, 7  ;;  %v3303_v36 = vpack.c.bf16 %v1399_v30, %v1399_v30 }
 0x1b3   : > { %v3737_v33 = vld [vmem:[#allocation3 + $0x8] sm:$0xff]   ;;  %1590 = vst [vmem:[#allocation3 + $0x38] sm:$0xf] %v1589_v32  ;;  %1593 = vst [vmem:[#allocation3 + $0x3c] sm:$0x1] %v1592_v34  ;;  %3566 = vmatmul.mubr.bf16.vlgmr.msra.gmra.mxu0 %v3736_v31  ;;  %v3738_v41 = vld [vmem:[#allocation3 + $0x18] sm:$0xff]  }
 0x1b4   : > { %v1510_v37 = vor.u32 %v1508_v28, %v1507_v35  ;;  %v1511_v38 = vrot.slane %v1507_v35, 4  ;;  %v1513_v39 = vshrl.u32 %v3303_v36, 16  ;;  %v1600_v42 = vld [vmem:[#allocation3 + $0x48] sm:$0xf]  ;;  %v1603_v43 = vld [vmem:[#allocation3 + $0x4c] sm:$0x1]  ;;  %2102 = vmatmul.mubr.bf16.gmra.mxu1 %v3737_v33 }
 0x1b5   : > { %v3739_v44 = vld [vmem:[#allocation3 + $0x20] sm:$0xff]   ;;  %v1624_v45 = vld [vmem:[#allocation3 + $0x30] sm:$0x1]  ;;  %v1516_v49 = vshll.u32 %v3303_v36, 16  ;;  %2109 = vmatprep.mubr.bf16.mxu1 %v3738_v41  ;;  %v3745_v13 = vld [vmem:[#allocation3 + $0x18] sm:$0xff]   ;;  %vm2933_vm9 = vcmask 31744  }
 0x1b6   : > { %v1654_v58 = vld [vmem:[#allocation3 + $0x34] sm:$0xf]  ;;  %v1595_v46 = vsel %vm4323_vm3, %v1510_v37, %v1594_v29  ;;  %v1598_v47 = vsel %vm4328_vm4, %v1511_v38, %v1597_v62  ;;  %v1515_v48 = vrot.slane %v1513_v39, 7  ;;  %v1625_v51 = vsel %vm4328_vm4, 0, %v1624_v45  ;;  %3569 = vmatprep.mubr.bf16.mxu0 %v3739_v44  ;;  %v3742_v6 = vld [vmem:[#allocation3 + $0x20] sm:$0xff]   ;;  %v3759_v60 = vld [vmem:[%s366_s25 + $0x8] sm:$0xff]  }
 0x1b7   : > { %v1655_v1 = vsel %vm4323_vm3, 0, %v1654_v58  ;;  %1596 = vst [vmem:[#allocation3 + $0x40] sm:$0xf] %v1595_v46  ;;  %1599 = vst [vmem:[#allocation3 + $0x44] sm:$0x1] %v1598_v47  ;;  %v3748_v8 = vld [vmem:[#allocation3 + $0x20] sm:$0xff]  }
 0x1b8   : > { %1626 = vst [vmem:[#allocation3 + $0x30] sm:$0x1] %v1625_v51  ;;  %1656 = vst [vmem:[#allocation3 + $0x34] sm:$0xf] %v1655_v1  ;;  %v1518_v52 = vor.u32 %v1516_v49, %v1515_v48  ;;  %v1519_v55 = vrot.slane %v1515_v48, 4  ;;  %v3757_v24 = vld [vmem:[%s4696_s6] sm:$0xff]  }
 0x1b9   : > { %v3740_v57 = vld [vmem:[#allocation3 + $0x28] sm:$0xff]   ;;  %3583 = vmatprep.subr.bf16.mxu1 %v3757_v24  ;;  %v3758_v0 = vld [vmem:[%s366_s25] sm:$0xff]   ;;  %v3760_v25 = vld [vmem:[%s366_s25 + $0x10] sm:$0xff]   ;;  %vm2982_vm10 = vcmask 64544  }
 0x1ba   : > { %v1627_v59 = vld [vmem:[#allocation3 + $0x38] sm:$0x1]  ;;  %v1657_v61 = vld [vmem:[#allocation3 + $0x3c] sm:$0xf]  ;;  %v1601_v63 = vsel %vm4323_vm3, %v1518_v52, %v1600_v42  ;;  %v1604_v2 = vsel %vm4328_vm4, %v1519_v55, %v1603_v43  ;;  %v3746_v16 = vld [vmem:[#allocation3 + $0x28] sm:$0xff]   ;;  %3584 = vmatpush3.bf16.msra.mxu1 %v3757_v24 }
 0x1bb   : > { %v1628_v3 = vsel %vm4328_vm4, 0, %v1627_v59  ;;  %v1658_v4 = vsel %vm4323_vm3, 0, %v1657_v61  ;;  %1602 = vst [vmem:[#allocation3 + $0x48] sm:$0xf] %v1601_v63  ;;  %1605 = vst [vmem:[#allocation3 + $0x4c] sm:$0x1] %v1604_v2  ;;  %3570 = vmatmul.mubr.bf16.gmra.mxu0 %v3740_v57 }
 0x1bc   : > { %1629 = vst [vmem:[#allocation3 + $0x38] sm:$0x1] %v1628_v3  ;;  %1659 = vst [vmem:[#allocation3 + $0x3c] sm:$0xf] %v1658_v4  ;;  %2110 = vmatmul.mubr.bf16.gmra.mxu1 %v3741_v5  ;;  %v3750_v11 = vld [vmem:[#allocation3 + $0x28] sm:$0xff]  }
 0x1bd   : > { %2117 = vmatprep.mubr.bf16.mxu1 %v3742_v6  ;;  %v3761_v56 = vld [vmem:[%s366_s25 + $0x18] sm:$0xff]  }
 0x1be   : > { %v1630_v54 = vld [vmem:[#allocation3 + $0x40] sm:$0x1]  ;;  %v1660_v7 = vld [vmem:[#allocation3 + $0x44] sm:$0xf] }
 0x1bf   : > { %v1631_v9 = vsel %vm4328_vm4, 0, %v1630_v54  ;;  %v1661_v10 = vsel %vm4323_vm3, 0, %v1660_v7  ;;  %v3743_v12 = vld [vmem:[#allocation3 + $0x30] sm:$0xff]  }
 0x1c0   : > { %1632 = vst [vmem:[#allocation3 + $0x40] sm:$0x1] %v1631_v9  ;;  %1662 = vst [vmem:[#allocation3 + $0x44] sm:$0xf] %v1661_v10  ;;  %3573 = vmatprep.mubr.bf16.mxu0 %v3743_v12  ;;  %v3749_v20 = vld [vmem:[#allocation3 + $0x30] sm:$0xff]  }
 0x1c1   : > { %v3752_v22 = vld [vmem:[#allocation3 + $0x30] sm:$0xff]  }
 0x1c2   : > { %v1633_v14 = vld [vmem:[#allocation3 + $0x48] sm:$0x1]  ;;  %v1663_v15 = vld [vmem:[#allocation3 + $0x4c] sm:$0xf] }
 0x1c3   : > { %v1634_v17 = vsel %vm4328_vm4, 0, %v1633_v14  ;;  %v1664_v18 = vsel %vm4323_vm3, 0, %v1663_v15  ;;  %v3744_v50 = vld [vmem:[#allocation3 + $0x38] sm:$0xff]  }
 0x1c4   : > { %1635 = vst [vmem:[#allocation3 + $0x48] sm:$0x1] %v1634_v17  ;;  %1665 = vst [vmem:[#allocation3 + $0x4c] sm:$0xf] %v1664_v18  ;;  %2118 = vmatmul.mubr.bf16.gmra.mxu1 %v3745_v13  ;;  %3574 = vmatmul.mubr.bf16.gmra.mxu0 %v3744_v50  ;;  %v3751_v40 = vld [vmem:[#allocation3 + $0x38] sm:$0xff]  }
 0x1c5   : > { %1673 = vst [vmem:[#allocation3 + $0x48] sm:$0xf] %v3825_v53  ;;  %1674 = vst [vmem:[#allocation3 + $0x4c] sm:$0xf] %v3825_v53  ;;  %2125 = vmatprep.mubr.bf16.mxu1 %v3746_v16  ;;  %v3755_v53 = vld [vmem:[#allocation3 + $0x38] sm:$0xff]  }
 0x1c7   : > { %v3747_v19 = vld [vmem:[#allocation3 + $0x40] sm:$0xff]  }
 0x1c8   : > { %3577 = vmatprep.mubr.bf16.mxu0 %v3747_v19  ;;  %v3753_v23 = vld [vmem:[#allocation3 + $0x40] sm:$0xff]  }
 0x1cc   : > { %v3754_v21 = vld [vmem:[#allocation3 + $0x48] sm:$0xff]   ;;  %2126 = vmatmul.mubr.bf16.gmra.mxu1 %v3748_v8 }
 0x1cd   : > { %2133 = vmatprep.mubr.bf16.mxu1 %v3749_v20  ;;  %3578 = vmatmul.mubr.bf16.gmra.mxu0 %v3754_v21 }
 0x1d4   : > { %2134 = vmatmul.mubr.bf16.gmra.mxu1 %v3750_v11 }
 0x1d5   : > { %2141 = vmatprep.mubr.bf16.mxu1 %v3751_v40 }
 0x1dc   : > { %2142 = vmatmul.mubr.bf16.gmra.mxu1 %v3752_v22 }
 0x1dd   : > { %2149 = vmatprep.mubr.bf16.mxu1 %v3753_v23 }
 0x1e4   : > { %2150 = vmatmul.mubr.bf16.gmra.mxu1 %v3755_v53 }
 0x1e5   : > { %3585 = vmatprep.mubr.msk.bf16.mxu1 %vm2512_vm13, %v3758_v0 }
 0x1ec   : > { %3586 = vmatmul.mubr.msk.bf16.vlgmr.msra.gmra.mxu1 %vm2512_vm13, %v3759_v60 }
 0x1ed   : > { %3589 = vmatprep.mubr.msk.bf16.mxu1 %vm2512_vm13, %v3760_v25 }
 0x1f4   : > { %3590 = vmatmul.mubr.msk.bf16.gmra.mxu1 %vm2512_vm13, %v3761_v56 }
 0x26a   : > { %v3356_v26 = vpop.f32.mrf.mxu1 }
 0x26c   : > { %v3357_v27 = vpop.f32.mrf.mxu1 }
 0x26d   : > { %v3358_v32 = vadd.f32 %v3357_v27, %v3356_v26 }
 0x26e   : > { %v3359_v28 = vpop.f32.mrf.mxu1 }
 0x270   : > { %v3360_v29 = vpop.f32.mrf.mxu1 }
 0x271   : > { %v3361_v36 = vadd.f32 %v3360_v29, %v3359_v28 }
 0x273   : > { %v3567_v62 = vpop.f32.mrf.mxu0 }
 0x274   : > { %v3362_v30 = vpop.f32.mrf.mxu1 }
 0x275   : > { %v2192_v31 = vpop.f32.mrf.mxu0 }
 0x276   : > { %v3363_v34 = vpop.f32.mrf.mxu1  ;;  %v4440_v33 = vadd.f32 %v3358_v32, %v2192_v31 }
 0x277   : > { %v3568_v35 = vpop.f32.mrf.mxu0  ;;  %v3364_v37 = vadd.f32 %v3363_v34, %v3362_v30 }
 0x278   : > { %v3365_v38 = vpop.f32.mrf.mxu1  ;;  %v2272_v44 = vrot.slane %v4440_v33, 1  ;;  %v2328_v55 = vrot.slane %v4440_v33, 2 }
 0x279   : > { %v2195_v39 = vpop.f32.mrf.mxu0  ;;  %v4443_v45 = vadd.f32 %v3567_v62, %v3364_v37 }
 0x27a   : > { %v2196_v41 = vadd.f32 %v3361_v36, %v2195_v39  ;;  %v3366_v42 = vpop.f32.mrf.mxu1 }
 0x27b   : > { %v3571_v43 = vpop.f32.mrf.mxu0  ;;  %v3367_v46 = vadd.f32 %v3366_v42, %v3365_v38  ;;  %v2275_v61 = vrot.slane %v4443_v45, 1  ;;  %v2331_v9 = vrot.slane %v4443_v45, 2 }
 0x27c   : > { %v2273_v58 = vrot.slane %v2196_v41, 1  ;;  %v3368_v47 = vpop.f32.mrf.mxu1  ;;  %v2329_v49 = vrot.slane %v2196_v41, 2 }
 0x27d   : > { %v2208_v48 = vpop.f32.mrf.mxu0  ;;  %v2204_v51 = vadd.f32 %v3568_v35, %v3367_v46 }
 0x27e   : > { %v2274_v1 = vsel %vm2271_vm14, %v2272_v44, %v2273_v58  ;;  %v3369_v52 = vpop.f32.mrf.mxu1  ;;  %v2330_v5 = vsel %vm926_vm2, %v2328_v55, %v2329_v49 }
 0x27f   : > { %2296 = vrot.lane.b32.xlu0 %v2274_v1, %s3826_s22  ;;  %v2276_v57 = vrot.slane %v2204_v51, 1  ;;  %v3370_v59 = vadd.f32 %v3369_v52, %v3368_v47  ;;  %v3572_v63 = vpop.f32.mrf.mxu0  ;;  %v2332_v3 = vrot.slane %v2204_v51, 2 }
 0x280   : > { %v3371_v2 = vpop.f32.mrf.mxu1 }
 0x281   : > { %v2277_v4 = vsel %vm2271_vm14, %v2275_v61, %v2276_v57  ;;  %v4453_v54 = vadd.f32 %v3370_v59, %v2208_v48  ;;  %v2211_v10 = vpop.f32.mrf.mxu0  ;;  %v2333_v14 = vsel %vm926_vm2, %v2331_v9, %v2332_v3 }
 0x282   : > { %v3372_v6 = vpop.f32.mrf.mxu1  ;;  %2298 = vrot.lane.b32.xlu1 %v2277_v4, %s3826_s22 }
 0x283   : > { %2352 = vrot.lane.b32.xlu0 %v2330_v5, %s3827_s26  ;;  %v3373_v7 = vadd.f32 %v3372_v6, %v3371_v2  ;;  %v2278_v18 = vrot.slane %v4453_v54, 1  ;;  %v2334_v22 = vrot.slane %v4453_v54, 2 }
 0x284   : > { %v3374_v12 = vpop.f32.mrf.mxu1  ;;  %v3575_v50 = vpop.f32.mrf.mxu0 }
 0x285   : > { %v2212_v13 = vadd.f32 %v3373_v7, %v2211_v10 }
 0x286   : > { %v3375_v15 = vpop.f32.mrf.mxu1  ;;  %2354 = vrot.lane.b32.xlu1 %v2333_v14, %s3827_s26  ;;  %v2224_v23 = vpop.f32.mrf.mxu0 }
 0x287   : > { %v2279_v16 = vrot.slane %v2212_v13, 1  ;;  %v3376_v17 = vadd.f32 %v3375_v15, %v3374_v12  ;;  %v2335_v8 = vrot.slane %v2212_v13, 2 }
 0x288   : > { %v3377_v19 = vpop.f32.mrf.mxu1  ;;  %v3576_v27 = vpop.f32.mrf.mxu0 }
 0x289   : > { %v2280_v20 = vsel %vm2271_vm14, %v2278_v18, %v2279_v16  ;;  %v4461_v11 = vadd.f32 %v3571_v43, %v3376_v17  ;;  %v2336_v0 = vsel %vm926_vm2, %v2334_v22, %v2335_v8 }
 0x28a   : > { %v3378_v21 = vpop.f32.mrf.mxu1  ;;  %2300 = vrot.lane.b32.xlu0 %v2280_v20, %s3826_s22  ;;  %v2227_v35 = vpop.f32.mrf.mxu0 }
 0x28b   : > { %v3379_v40 = vadd.f32 %v3378_v21, %v3377_v19  ;;  %v2281_v26 = vrot.slane %v4461_v11, 1  ;;  %v2337_v34 = vrot.slane %v4461_v11, 2 }
 0x28c   : > { %v3380_v53 = vpop.f32.mrf.mxu1 }
 0x28d   : > { %v2220_v24 = vadd.f32 %v3572_v63, %v3379_v40  ;;  %v3579_v41 = vpop.f32.mrf.mxu0 }
 0x28e   : > { %v3381_v60 = vpop.f32.mrf.mxu1  ;;  %2356 = vrot.lane.b32.xlu0 %v2336_v0, %s3827_s26 }
 0x28f   : > { %v2282_v25 = vrot.slane %v2220_v24, 1  ;;  %v3382_v56 = vadd.f32 %v3381_v60, %v3380_v53  ;;  %v2338_v29 = vrot.slane %v2220_v24, 2  ;;  %v2240_v49 = vpop.f32.mrf.mxu0 }
 0x290   : > { %v3383_v28 = vpop.f32.mrf.mxu1 }
 0x291   : > { %v2283_v62 = vsel %vm2271_vm14, %v2281_v26, %v2282_v25  ;;  %v4469_v31 = vadd.f32 %v3382_v56, %v2224_v23  ;;  %v2339_v38 = vsel %vm926_vm2, %v2337_v34, %v2338_v29  ;;  %v3580_v63 = vpop.f32.mrf.mxu0  ;;  %v4508_v34 = vld [vmem:[%s4695_s5] ss:$0 sm:$0xff] }
 0x292   : > { %v3384_v30 = vpop.f32.mrf.mxu1  ;;  %2302 = vrot.lane.b32.xlu1 %v2283_v62, %s3826_s22 }
 0x293   : > { %v3385_v32 = vadd.f32 %v3384_v30, %v3383_v28  ;;  %v2284_v44 = vrot.slane %v4469_v31, 1  ;;  %v2340_v52 = vrot.slane %v4469_v31, 2  ;;  %v2243_v10 = vpop.f32.mrf.mxu0 }
 0x294   : > { %v3386_v36 = vpop.f32.mrf.mxu1 }
 0x295   : > { %v2228_v37 = vadd.f32 %v3385_v32, %v2227_v35 }
 0x296   : > { %v3387_v39 = vpop.f32.mrf.mxu1  ;;  %2358 = vrot.lane.b32.xlu1 %v2339_v38, %s3827_s26 }
 0x297   : > { %v2285_v42 = vrot.slane %v2228_v37, 1  ;;  %v3388_v43 = vadd.f32 %v3387_v39, %v3386_v36  ;;  %v2341_v46 = vrot.slane %v2228_v37, 2 }
 0x298   : > { %v3389_v58 = vpop.f32.mrf.mxu1 }
 0x299   : > { %v2286_v47 = vsel %vm2271_vm14, %v2284_v44, %v2285_v42  ;;  %v4477_v51 = vadd.f32 %v3575_v50, %v3388_v43  ;;  %v2342_v59 = vsel %vm926_vm2, %v2340_v52, %v2341_v46 }
 0x29a   : > { %v3390_v48 = vpop.f32.mrf.mxu1  ;;  %2304 = vrot.lane.b32.xlu0 %v2286_v47, %s3826_s22 }
 0x29b   : > { %v3391_v1 = vadd.f32 %v3390_v48, %v3389_v58  ;;  %v2287_v4 = vrot.slane %v4477_v51, 1  ;;  %v2343_v14 = vrot.slane %v4477_v51, 2 }
 0x29c   : > { %v3392_v55 = vpop.f32.mrf.mxu1 }
 0x29d   : > { %v2236_v57 = vadd.f32 %v3576_v27, %v3391_v1 }
 0x29e   : > { %v3393_v61 = vpop.f32.mrf.mxu1  ;;  %2360 = vrot.lane.b32.xlu0 %v2342_v59, %s3827_s26 }
 0x29f   : > { %v2288_v2 = vrot.slane %v2236_v57, 1  ;;  %v3394_v3 = vadd.f32 %v3393_v61, %v3392_v55  ;;  %v2344_v6 = vrot.slane %v2236_v57, 2 }
 0x2a0   : > { %v3395_v5 = vpop.f32.mrf.mxu1 }
 0x2a1   : > { %v2289_v7 = vsel %vm2271_vm14, %v2287_v4, %v2288_v2  ;;  %v4485_v12 = vadd.f32 %v3394_v3, %v2240_v49  ;;  %v2345_v17 = vsel %vm926_vm2, %v2343_v14, %v2344_v6 }
 0x2a2   : > { %v3396_v9 = vpop.f32.mrf.mxu1  ;;  %2306 = vrot.lane.b32.xlu1 %v2289_v7, %s3826_s22 }
 0x2a3   : > { %v3397_v13 = vadd.f32 %v3396_v9, %v3395_v5  ;;  %v2290_v50 = vrot.slane %v4485_v12, 1  ;;  %v2346_v23 = vrot.slane %v4485_v12, 2 }
 0x2a4   : > { %v3398_v15 = vpop.f32.mrf.mxu1 }
 0x2a5   : > { %v2244_v16 = vadd.f32 %v3397_v13, %v2243_v10 }
 0x2a6   : > { %v3399_v18 = vpop.f32.mrf.mxu1  ;;  %2362 = vrot.lane.b32.xlu1 %v2345_v17, %s3827_s26 }
 0x2a7   : > { %v2291_v19 = vrot.slane %v2244_v16, 1  ;;  %v3400_v8 = vadd.f32 %v3399_v18, %v3398_v15  ;;  %v2347_v21 = vrot.slane %v2244_v16, 2 }
 0x2a8   : > { %v3401_v20 = vpop.f32.mrf.mxu1 }
 0x2a9   : > { %v2292_v40 = vsel %vm2271_vm14, %v2290_v50, %v2291_v19  ;;  %v4494_v53 = vadd.f32 %v3579_v41, %v3400_v8  ;;  %v2348_v60 = vsel %vm926_vm2, %v2346_v23, %v2347_v21 }
 0x2aa   : > { %v3402_v22 = vpop.f32.mrf.mxu1  ;;  %2308 = vrot.lane.b32.xlu0 %v2292_v40, %s3826_s22 }
 0x2ab   : > { %v3403_v24 = vadd.f32 %v3402_v22, %v3401_v20  ;;  %v2293_v56 = vrot.slane %v4494_v53, 1  ;;  %v2349_v28 = vrot.slane %v4494_v53, 2 }
 0x2ad   : > { %v2252_v0 = vadd.f32 %v3580_v63, %v3403_v24 }
 0x2ae   : > { %2364 = vrot.lane.b32.xlu0 %v2348_v60, %s3827_s26 }
 0x2af   : > { %v2294_v25 = vrot.slane %v2252_v0, 1  ;;  %v2350_v26 = vrot.slane %v2252_v0, 2 }
 0x2b1   : > { %v2295_v27 = vsel %vm2271_vm14, %v2293_v56, %v2294_v25  ;;  %v2351_v29 = vsel %vm926_vm2, %v2349_v28, %v2350_v26  ;;  %v4550_v26 = vpop.f32.mrf.mxu1 }
 0x2b2   : > { %2310 = vrot.lane.b32.xlu1 %v2295_v27, %s3826_s22  ;;  %v4558_v27 = vld [vmem:[%s4697_s7 + $0x8] sm:$0xff]  }
 0x2b6   : > { %2366 = vrot.lane.b32.xlu1 %v2351_v29, %s3827_s26 }
 0x2f1   : > { %v2297_v62 = vpop.permute.xlu0 %2296 }
 0x2f2   : > { %v2320_v30 = vadd.f32 %v2297_v62, %v4440_v33 }
 0x2f4   : > { %v2299_v32 = vpop.permute.xlu1 %2298 }
 0x2f5   : > { %v2353_v35 = vpop.permute.xlu0 %2352  ;;  %v2321_v37 = vadd.f32 %v2299_v32, %v4443_v45  ;;  %v2563_v32 = vpop.f32.mrf.mxu1 }
 0x2f6   : > { %v2376_v36 = vadd.f32 %v2353_v35, %v2320_v30 }
 0x2f8   : > { %v2391_v38 = vadd.f32 %v4508_v34, %v2376_v36  ;;  %v2355_v39 = vpop.permute.xlu1 %2354 }
 0x2f9   : > { %v2377_v41 = vadd.f32 %v2355_v39, %v2321_v37  ;;  %v3588_v37 = vpop.f32.mrf.mxu1 }
 0x2fa   : > { %vm2399_vm2 = vcmp.ge.f32.partialorder %v2391_v38, 0.0  ;;  %v2407_v42 = vmul.f32 0.1, %v2391_v38 }
 0x2fb   : > { %v2392_v43 = vadd.f32 %v4508_v34, %v2377_v41  ;;  %v2566_v39 = vpop.f32.mrf.mxu1 }
 0x2fc   : > { %v4513_v33 = vsel %vm2399_vm2, %v2391_v38, %v2407_v42  ;;  %v2301_v44 = vpop.permute.xlu0 %2300 }
 0x2fd   : > { %v2424_v58 = vsel %vm2423_vm15, %v4513_v33, -inf  ;;  %vm2400_vm0 = vcmp.ge.f32.partialorder %v2392_v43, 0.0  ;;  %v2408_v46 = vmul.f32 0.1, %v2392_v43  ;;  %v2322_v45 = vadd.f32 %v2301_v44, %v4453_v54  ;;  %v4588_v41 = vpop.f32.mrf.mxu1 }
 0x2fe   : > { %2425 = vmax.xlane.f32.xlu0 %v2424_v58 }
 0x2ff   : > { %v4518_v47 = vsel %vm2400_vm0, %v2392_v43, %v2408_v46  ;;  %v2579_v42 = vpop.f32.mrf.mxu1 }
 0x300   : > { %v2357_v48 = vpop.permute.xlu0 %2356  ;;  %v2427_v49 = vsel %vm2423_vm15, %v4518_v47, -inf }
 0x301   : > { %v2378_v1 = vadd.f32 %v2357_v48, %v2322_v45  ;;  %2428 = vmax.xlane.f32.xlu1 %v2427_v49  ;;  %v4593_v43 = vpop.f32.mrf.mxu1 }
 0x303   : > { %v2393_v52 = vadd.f32 %v4508_v34, %v2378_v1  ;;  %v4596_v44 = vpop.f32.mrf.mxu1 }
 0x304   : > { %v2303_v55 = vpop.permute.xlu1 %2302 }
 0x305   : > { %vm2401_vm1 = vcmp.ge.f32.partialorder %v2393_v52, 0.0  ;;  %v2409_v57 = vmul.f32 0.1, %v2393_v52  ;;  %v2323_v59 = vadd.f32 %v2303_v55, %v4461_v11 }
 0x307   : > { %v4524_v61 = vsel %vm2401_vm1, %v2393_v52, %v2409_v57 }
 0x308   : > { %v2359_v63 = vpop.permute.xlu1 %2358  ;;  %v2430_v54 = vsel %vm2423_vm15, %v4524_v61, -inf }
 0x309   : > { %v2379_v2 = vadd.f32 %v2359_v63, %v2323_v59  ;;  %2431 = vmax.xlane.f32.xlu0 %v2430_v54 }
 0x30b   : > { %v2394_v3 = vadd.f32 %v4508_v34, %v2379_v2 }
 0x30c   : > { %v2305_v4 = vpop.permute.xlu0 %2304 }
 0x30d   : > { %vm2402_vm3 = vcmp.ge.f32.partialorder %v2394_v3, 0.0  ;;  %v2410_v5 = vmul.f32 0.1, %v2394_v3  ;;  %v2324_v6 = vadd.f32 %v2305_v4, %v4469_v31 }
 0x30f   : > { %v4530_v7 = vsel %vm2402_vm3, %v2394_v3, %v2410_v5 }
 0x310   : > { %v2361_v9 = vpop.permute.xlu0 %2360  ;;  %v2433_v11 = vsel %vm2423_vm15, %v4530_v7, -inf }
 0x311   : > { %v2380_v10 = vadd.f32 %v2361_v9, %v2324_v6  ;;  %2434 = vmax.xlane.f32.xlu0 %v2433_v11 }
 0x313   : > { %v2395_v13 = vadd.f32 %v4508_v34, %v2380_v10 }
 0x314   : > { %v2307_v14 = vpop.permute.xlu1 %2306 }
 0x315   : > { %vm2403_vm4 = vcmp.ge.f32.partialorder %v2395_v13, 0.0  ;;  %v2411_v15 = vmul.f32 0.1, %v2395_v13  ;;  %v2325_v16 = vadd.f32 %v2307_v14, %v4477_v51 }
 0x317   : > { %v4536_v17 = vsel %vm2403_vm4, %v2395_v13, %v2411_v15 }
 0x318   : > { %v2363_v18 = vpop.permute.xlu1 %2362  ;;  %v2436_v31 = vsel %vm2423_vm15, %v4536_v17, -inf }
 0x319   : > { %v2381_v50 = vadd.f32 %v2363_v18, %v2325_v16  ;;  %2437 = vmax.xlane.f32.xlu1 %v2436_v31 }
 0x31b   : > { %v2396_v19 = vadd.f32 %v4508_v34, %v2381_v50 }
 0x31c   : > { %v2309_v8 = vpop.permute.xlu0 %2308 }
 0x31d   : > { %vm2404_vm5 = vcmp.ge.f32.partialorder %v2396_v19, 0.0  ;;  %v2412_v20 = vmul.f32 0.1, %v2396_v19  ;;  %v2326_v21 = vadd.f32 %v2309_v8, %v4485_v12  ;;  %v3762_v12 = vld [vmem:[%s4697_s7 + $0x10] ss:$0 sps:$4 sm:$0x33]  }
 0x31e   : > { %3636 = vmatprep.subr.msk.bf16.mxu0 %vm2678_vm7, %v3762_v12  ;;  %3637 = vmatprep.subr.msk.bf16.mxu1 %vm2678_vm7, %v3762_v12 }
 0x31f   : > { %v4542_v40 = vsel %vm2404_vm5, %v2396_v19, %v2412_v20 }
 0x320   : > { %v2365_v22 = vpop.permute.xlu0 %2364  ;;  %v2439_v51 = vsel %vm2423_vm15, %v4542_v40, -inf }
 0x321   : > { %v2382_v23 = vadd.f32 %v2365_v22, %v2326_v21  ;;  %2440 = vmax.xlane.f32.xlu0 %v2439_v51 }
 0x323   : > { %v2397_v24 = vadd.f32 %v4508_v34, %v2382_v23 }
 0x324   : > { %v2311_v0 = vpop.permute.xlu1 %2310 }
 0x325   : > { %vm2405_vm6 = vcmp.ge.f32.partialorder %v2397_v24, 0.0  ;;  %v2413_v60 = vmul.f32 0.1, %v2397_v24  ;;  %v2327_v25 = vadd.f32 %v2311_v0, %v4494_v53  ;;  %v4564_v53 = vsel %vm2678_vm7, %v3762_v12, 0 }
 0x326   : > { %3594 = vmatpush3.bf16.msra.mxu0 %v4564_v53  ;;  %3608 = vmatpush3.bf16.msra.mxu1 %v4564_v53 }
 0x327   : > { %v4548_v56 = vsel %vm2405_vm6, %v2397_v24, %v2413_v60  ;;  %3595 = vmatprep.subr.bf16.mxu0 %v4558_v27  ;;  %3609 = vmatprep.subr.bf16.mxu1 %v4558_v27 }
 0x328   : > { %v2367_v28 = vpop.permute.xlu1 %2366  ;;  %v2442_v29 = vsel %vm2423_vm15, %v4548_v56, -inf }
 0x329   : > { %v2383_v62 = vadd.f32 %v2367_v28, %v2327_v25  ;;  %2443 = vmax.xlane.f32.xlu1 %v2442_v29 }
 0x32a   : > { %3596 = vmatpush3.bf16.msra.mxu0 %v4558_v27  ;;  %3610 = vmatpush3.bf16.msra.mxu1 %v4558_v27 }
 0x32b   : > { %v2398_v30 = vadd.f32 %v4508_v34, %v2383_v62  ;;  %v4579_v34 = vld [vmem:[%s4697_s7] sm:$0xff]  }
 0x32c   : > { %3597 = vmatprep.subr.bf16.mxu0 %v4579_v34  ;;  %3611 = vmatprep.subr.bf16.mxu1 %v4579_v34 }
 0x32d   : > { %vm2406_vm8 = vcmp.ge.f32.partialorder %v2398_v30, 0.0  ;;  %v2414_v35 = vmul.f32 0.1, %v2398_v30 }
 0x32e   : > { %3598 = vmatpush3.bf16.msra.mxu0 %v4579_v34  ;;  %3612 = vmatpush3.bf16.msra.mxu1 %v4579_v34 }
 0x32f   : > { %v4573_v36 = vsel %vm2406_vm8, %v2398_v30, %v2414_v35  ;;  %3638 = vmatprep.subr.msk.bf16.mxu0 %vm2678_vm7, %v3762_v12 }
 0x330   : > { %v2445_v38 = vsel %vm2423_vm15, %v4573_v36, -inf }
 0x331   : > { %2446 = vmax.xlane.f32.xlu0 %v2445_v38 }
 0x33a   : > { %2610 = vrot.lane.b32.xlu1 %v2563_v32, %s3826_s22 }
 0x33e   : > { %2614 = vrot.lane.b32.xlu1 %v4550_v26, %s3826_s22 }
 0x342   : > { %2616 = vrot.lane.b32.xlu1 %v3588_v37, %s3826_s22 }
 0x346   : > { %2620 = vrot.lane.b32.xlu1 %v4596_v44, %s3826_s22 }
 0x347   : > { %2612 = vrot.lane.b32.xlu0 %v2566_v39, %s3826_s22 }
 0x34a   : > { %2624 = vrot.lane.b32.xlu1 %v4593_v43, %s3826_s22 }
 0x34b   : > { %2618 = vrot.lane.b32.xlu0 %v2579_v42, %s3826_s22 }
 0x34f   : > { %2622 = vrot.lane.b32.xlu0 %v4588_v41, %s3826_s22 }
 0x387   : > { %v2426_v58 = vpop.xlane.xlu0 %2425 }
 0x388   : > { %v2448_v46 = vsub.f32 %v4513_v33, %v2426_v58 }
 0x38a   : > { %v2456_v45 = vmul.f32 1.442695, %v2448_v46  ;;  %v2429_v48 = vpop.xlane.xlu1 %2428 }
 0x38b   : > { %v2449_v49 = vsub.f32 %v4518_v47, %v2429_v48 }
 0x38c   : > { %3765 = vpow2.f32 %v2456_v45 }
 0x38d   : > { %v2458_v1 = vmul.f32 1.442695, %v2449_v49 }
 0x38f   : > { %3767 = vpow2.f32 %v2458_v1 }
 0x392   : > { %v2432_v52 = vpop.xlane.xlu0 %2431 }
 0x393   : > { %v2450_v55 = vsub.f32 %v4524_v61, %v2432_v52 }
 0x395   : > { %v2460_v57 = vmul.f32 1.442695, %v2450_v55 }
 0x397   : > { %3769 = vpow2.f32 %v2460_v57 }
 0x399   : > { %v3766_v59 = vpop.eup %3765 }
 0x39a   : > { %v2435_v63 = vpop.xlane.xlu0 %2434  ;;  %v2594_v33 = vmul.f32 %v3766_v59, %v2563_v32 }
 0x39b   : > { %v2451_v54 = vsub.f32 %v4530_v7, %v2435_v63 }
 0x39c   : > { %v3768_v2 = vpop.eup %3767 }
 0x39d   : > { %v2462_v3 = vmul.f32 1.442695, %v2451_v54  ;;  %v2647_v4 = vpack.c.bf16 %v3768_v2, %v3766_v59  ;;  %v2595_v5 = vmul.f32 %v3768_v2, %v2566_v39 }
 0x39f   : > { %3771 = vpow2.f32 %v2462_v3  ;;  %3599 = vmatprep.mubr.msk.bf16.mxu0 %vm2423_vm15, %v2647_v4  ;;  %v2747_v47 = vpack.c.bf16 %v2595_v5, %v2594_v33 }
 0x3a1   : > { %3613 = vmatprep.mubr.msk.bf16.mxu1 %vm2423_vm15, %v2747_v47 }
 0x3a2   : > { %v2438_v6 = vpop.xlane.xlu1 %2437 }
 0x3a3   : > { %v2452_v61 = vsub.f32 %v4536_v17, %v2438_v6 }
 0x3a4   : > { %v3770_v11 = vpop.eup %3769 }
 0x3a5   : > { %v2464_v9 = vmul.f32 1.442695, %v2452_v61  ;;  %v2596_v16 = vmul.f32 %v3770_v11, %v4550_v26 }
 0x3a7   : > { %3773 = vpow2.f32 %v2464_v9 }
 0x3aa   : > { %v2441_v10 = vpop.xlane.xlu0 %2440 }
 0x3ab   : > { %v2453_v7 = vsub.f32 %v4542_v40, %v2441_v10 }
 0x3ac   : > { %v3772_v13 = vpop.eup %3771 }
 0x3ad   : > { %v2466_v14 = vmul.f32 1.442695, %v2453_v7  ;;  %v2648_v15 = vpack.c.bf16 %v3772_v13, %v3770_v11  ;;  %v2597_v18 = vmul.f32 %v3772_v13, %v3588_v37 }
 0x3af   : > { %3775 = vpow2.f32 %v2466_v14  ;;  %3600 = vmatmul.mubr.msk.bf16.vlgmr.msra.gmra.mxu0 %vm2423_vm15, %v2648_v15  ;;  %v2748_v31 = vpack.c.bf16 %v2597_v18, %v2596_v16 }
 0x3b0   : > { %3622 = vmatpush3.bf16.msra.mxu0 %v4564_v53 }
 0x3b1   : > { %3614 = vmatmul.mubr.msk.bf16.vlgmr.msra.gmra.mxu1 %vm2423_vm15, %v2748_v31  ;;  %3623 = vmatprep.subr.bf16.mxu0 %v4558_v27 }
 0x3b2   : > { %v2444_v17 = vpop.xlane.xlu1 %2443 }
 0x3b3   : > { %v2454_v50 = vsub.f32 %v4548_v56, %v2444_v17 }
 0x3b4   : > { %3624 = vmatpush3.bf16.msra.mxu0 %v4558_v27  ;;  %v3774_v19 = vpop.eup %3773 }
 0x3b5   : > { %3625 = vmatprep.subr.bf16.mxu0 %v4579_v34  ;;  %v2468_v8 = vmul.f32 1.442695, %v2454_v50  ;;  %v2598_v22 = vmul.f32 %v3774_v19, %v2579_v42 }
 0x3b6   : > { %v2611_v51 = vpop.permute.xlu1 %2610 }
 0x3b7   : > { %3777 = vpow2.f32 %v2468_v8  ;;  %v2634_v29 = vmul.f32 %v3766_v59, %v2611_v51 }
 0x3b8   : > { %3626 = vmatpush3.bf16.msra.mxu0 %v4579_v34 }
 0x3ba   : > { %v2447_v20 = vpop.xlane.xlu0 %2446  ;;  %v2615_v25 = vpop.permute.xlu1 %2614 }
 0x3bb   : > { %v2455_v21 = vsub.f32 %v4573_v36, %v2447_v20  ;;  %v2636_v42 = vmul.f32 %v3770_v11, %v2615_v25 }
 0x3bc   : > { %v3776_v40 = vpop.eup %3775 }
 0x3bd   : > { %v2470_v23 = vmul.f32 1.442695, %v2455_v21  ;;  %v2649_v24 = vpack.c.bf16 %v3776_v40, %v3774_v19  ;;  %v2599_v0 = vmul.f32 %v3776_v40, %v4596_v44 }
 0x3be   : > { %v2613_v56 = vpop.permute.xlu0 %2612  ;;  %v2617_v26 = vpop.permute.xlu1 %2616 }
 0x3bf   : > { %3779 = vpow2.f32 %v2470_v23  ;;  %3603 = vmatprep.mubr.msk.bf16.mxu0 %vm2423_vm15, %v2649_v24  ;;  %v2749_v60 = vpack.c.bf16 %v2599_v0, %v2598_v22  ;;  %v2635_v27 = vmul.f32 %v3768_v2, %v2613_v56  ;;  %v2637_v34 = vmul.f32 %v3772_v13, %v2617_v26 }
 0x3c1   : > { %3617 = vmatprep.mubr.msk.bf16.mxu1 %vm2423_vm15, %v2749_v60  ;;  %v2828_v32 = vpack.c.bf16 %v2635_v27, %v2634_v29  ;;  %v2829_v44 = vpack.c.bf16 %v2637_v34, %v2636_v42 }
 0x3c2   : > { %v2621_v35 = vpop.permute.xlu1 %2620  ;;  %v2619_v36 = vpop.permute.xlu0 %2618 }
 0x3c3   : > { %v2639_v38 = vmul.f32 %v3776_v40, %v2621_v35  ;;  %v2638_v39 = vmul.f32 %v3774_v19, %v2619_v36 }
 0x3c4   : > { %v3778_v12 = vpop.eup %3777 }
 0x3c5   : > { %v2600_v53 = vmul.f32 %v3778_v12, %v4588_v41  ;;  %v2830_v58 = vpack.c.bf16 %v2639_v38, %v2638_v39 }
 0x3c6   : > { %v2625_v46 = vpop.permute.xlu1 %2624  ;;  %v2623_v41 = vpop.permute.xlu0 %2622 }
 0x3c7   : > { %v2640_v45 = vmul.f32 %v3778_v12, %v2623_v41 }
 0x3cc   : > { %v3780_v28 = vpop.eup %3779 }
 0x3cd   : > { %v2650_v62 = vpack.c.bf16 %v3780_v28, %v3778_v12  ;;  %v2601_v30 = vmul.f32 %v3780_v28, %v4593_v43  ;;  %v2641_v43 = vmul.f32 %v3780_v28, %v2625_v46 }
 0x3cf   : > { %3604 = vmatmul.mubr.msk.bf16.gmra.mxu0 %vm2423_vm15, %v2650_v62  ;;  %v2750_v37 = vpack.c.bf16 %v2601_v30, %v2600_v53  ;;  %v2831_v48 = vpack.c.bf16 %v2641_v43, %v2640_v45 }
 0x3d0   : > { %3627 = vmatprep.mubr.msk.bf16.mxu0 %vm2423_vm15, %v2828_v32 }
 0x3d1   : > { %3618 = vmatmul.mubr.msk.bf16.gmra.mxu1 %vm2423_vm15, %v2750_v37 }
 0x3d7   : > { %3628 = vmatmul.mubr.msk.bf16.vlgmr.msra.gmra.mxu0 %vm2423_vm15, %v2829_v44 }
 0x3d8   : > { %3631 = vmatprep.mubr.msk.bf16.mxu0 %vm2423_vm15, %v2830_v58 }
 0x3df   : > { %3632 = vmatmul.mubr.msk.bf16.gmra.mxu0 %vm2423_vm15, %v2831_v48 }
 0x46f   : > { %v3601_v49 = vpop.f32.mrf.mxu0 }
 0x470   : > { %v2911_v1 = vmax.f32 %v3601_v49, 1e-30 }
 0x471   : > { %v2716_v52 = vpop.f32.mrf.mxu0  ;;  %v3615_v2 = vpop.f32.mrf.mxu1 }
 0x472   : > { %3781 = vrcp.f32 %v2911_v1  ;;  %v2909_v55 = vmax.f32 %v2716_v52, 1e-30 }
 0x473   : > { %v3602_v57 = vpop.f32.mrf.mxu0  ;;  %v2797_v3 = vpop.f32.mrf.mxu1 }
 0x474   : > { %3783 = vrcp.f32 %v2909_v55  ;;  %v2912_v59 = vmax.f32 %v3602_v57, 1e-30 }
 0x475   : > { %v2719_v63 = vpop.f32.mrf.mxu0  ;;  %v3616_v47 = vpop.f32.mrf.mxu1 }
 0x476   : > { %3785 = vrcp.f32 %v2912_v59  ;;  %v2910_v54 = vmax.f32 %v2719_v63, 1e-30 }
 0x477   : > { %v2800_v10 = vpop.f32.mrf.mxu1 }
 0x478   : > { %3787 = vrcp.f32 %v2910_v54 }
 0x47f   : > { %v3782_v4 = vpop.eup %3781 }
 0x480   : > { %v2927_v33 = vmul.f32 %v3782_v4, %v3615_v2 }
 0x481   : > { %v3784_v5 = vpop.eup %3783 }
 0x482   : > { %2936 = vst.msk [vmem:[%s4639_s20 + $0x10] sm:$0xff] %vm2933_vm9, %v2927_v33  ;;  %v2925_v6 = vmul.f32 %v3784_v5, %v2797_v3 }
 0x483   : > { %v3786_v61 = vpop.eup %3785 }
 0x484   : > { %2934 = vst.msk [vmem:[%s4639_s20] sm:$0xff] %vm2933_vm9, %v2925_v6  ;;  %v2928_v9 = vmul.f32 %v3786_v61, %v3616_v47 }
 0x485   : > { %v3788_v11 = vpop.eup %3787 }
 0x486   : > { %2937 = vst.msk [vmem:[%s4639_s20 + $0x18] sm:$0xff] %vm2933_vm9, %v2928_v9  ;;  %v2926_v7 = vmul.f32 %v3788_v11, %v2800_v10 }
 0x488   : > { %2935 = vst.msk [vmem:[%s4639_s20 + $0x8] sm:$0xff] %vm2933_vm9, %v2926_v7 }
 0x48f   : > { %v3605_v13 = vpop.f32.mrf.mxu0 }
 0x490   : > { %v2915_v14 = vmax.f32 %v3605_v13, 1e-30 }
 0x491   : > { %v2732_v15 = vpop.f32.mrf.mxu0  ;;  %v3619_v20 = vpop.f32.mrf.mxu1 }
 0x492   : > { %3789 = vrcp.f32 %v2915_v14  ;;  %v2913_v16 = vmax.f32 %v2732_v15, 1e-30 }
 0x493   : > { %v3606_v18 = vpop.f32.mrf.mxu0  ;;  %v2813_v23 = vpop.f32.mrf.mxu1 }
 0x494   : > { %3791 = vrcp.f32 %v2913_v16  ;;  %v2916_v31 = vmax.f32 %v3606_v18, 1e-30 }
 0x495   : > { %v2735_v17 = vpop.f32.mrf.mxu0  ;;  %v3620_v12 = vpop.f32.mrf.mxu1 }
 0x496   : > { %3793 = vrcp.f32 %v2916_v31  ;;  %v2914_v50 = vmax.f32 %v2735_v17, 1e-30 }
 0x497   : > { %v3629_v19 = vpop.f32.mrf.mxu0  ;;  %v2816_v35 = vpop.f32.mrf.mxu1 }
 0x498   : > { %3795 = vrcp.f32 %v2914_v50  ;;  %v2944_v8 = vmul.f32 %v3782_v4, %v3629_v19 }
 0x499   : > { %v2878_v21 = vpop.f32.mrf.mxu0 }
 0x49a   : > { %2962 = vrot.lane.b32.xlu0 %v2944_v8, %s3828_s27  ;;  %v2942_v22 = vmul.f32 %v3784_v5, %v2878_v21 }
 0x49b   : > { %v3630_v40 = vpop.f32.mrf.mxu0 }
 0x49c   : > { %v2945_v51 = vmul.f32 %v3786_v61, %v3630_v40 }
 0x49d   : > { %v2881_v24 = vpop.f32.mrf.mxu0 }
 0x49e   : > { %2958 = vrot.lane.b32.xlu0 %v2942_v22, %s3828_s27  ;;  %2964 = vrot.lane.b32.xlu1 %v2945_v51, %s3828_s27  ;;  %v2943_v56 = vmul.f32 %v3788_v11, %v2881_v24 }
 0x49f   : > { %v3790_v0 = vpop.eup %3789  ;;  %v3633_v60 = vpop.f32.mrf.mxu0 }
 0x4a0   : > { %v2931_v25 = vmul.f32 %v3790_v0, %v3619_v20  ;;  %v2948_v34 = vmul.f32 %v3790_v0, %v3633_v60 }
 0x4a1   : > { %v3792_v26 = vpop.eup %3791  ;;  %v2894_v27 = vpop.f32.mrf.mxu0 }
 0x4a2   : > { %2940 = vst.msk [vmem:[%s4639_s20 + $0x30] sm:$0xff] %vm2933_vm9, %v2931_v25  ;;  %v2929_v28 = vmul.f32 %v3792_v26, %v2813_v23  ;;  %v2946_v29 = vmul.f32 %v3792_v26, %v2894_v27  ;;  %2960 = vrot.lane.b32.xlu1 %v2943_v56, %s3828_s27 }
 0x4a3   : > { %v3794_v62 = vpop.eup %3793  ;;  %v3634_v53 = vpop.f32.mrf.mxu0 }
 0x4a4   : > { %2938 = vst.msk [vmem:[%s4639_s20 + $0x20] sm:$0xff] %vm2933_vm9, %v2929_v28  ;;  %v2932_v30 = vmul.f32 %v3794_v62, %v3620_v12  ;;  %2966 = vrot.lane.b32.xlu0 %v2946_v29, %s3828_s27  ;;  %v2949_v39 = vmul.f32 %v3794_v62, %v3634_v53 }
 0x4a5   : > { %v3796_v32 = vpop.eup %3795  ;;  %v2897_v36 = vpop.f32.mrf.mxu0 }
 0x4a6   : > { %2941 = vst.msk [vmem:[%s4639_s20 + $0x38] sm:$0xff] %vm2933_vm9, %v2932_v30  ;;  %v2930_v37 = vmul.f32 %v3796_v32, %v2816_v35  ;;  %v2947_v38 = vmul.f32 %v3796_v32, %v2897_v36 }
 0x4a8   : > { %2939 = vst.msk [vmem:[%s4639_s20 + $0x28] sm:$0xff] %vm2933_vm9, %v2930_v37  ;;  %2970 = vrot.lane.b32.xlu0 %v2948_v34, %s3828_s27  ;;  %2968 = vrot.lane.b32.xlu1 %v2947_v38, %s3828_s27 }
 0x4ac   : > { %2972 = vrot.lane.b32.xlu1 %v2949_v39, %s3828_s27 }
 0x50c   : > { %v2963_v42 = vpop.permute.xlu0 %2962 }
 0x50d   : > { %2985 = vst.msk [vmem:[%s4639_s20 + $0x10] sm:$0xff] %vm2982_vm10, %v2963_v42 }
 0x510   : > { %v2965_v44 = vpop.permute.xlu1 %2964  ;;  %v2959_v58 = vpop.permute.xlu0 %2958 }
 0x511   : > { %2986 = vst.msk [vmem:[%s4639_s20 + $0x18] sm:$0xff] %vm2982_vm10, %v2965_v44  ;;  %2983 = vst.msk [vmem:[%s4639_s20] sm:$0xff] %vm2982_vm10, %v2959_v58 }
 0x514   : > { %v2961_v46 = vpop.permute.xlu1 %2960 }
 0x515   : > { %2984 = vst.msk [vmem:[%s4639_s20 + $0x8] sm:$0xff] %vm2982_vm10, %v2961_v46 }
 0x516   : > { %v2967_v41 = vpop.permute.xlu0 %2966 }
 0x517   : > { %2987 = vst.msk [vmem:[%s4639_s20 + $0x20] sm:$0xff] %vm2982_vm10, %v2967_v41 }
 0x51a   : > { %v2969_v43 = vpop.permute.xlu1 %2968  ;;  %v2971_v45 = vpop.permute.xlu0 %2970 }
 0x51b   : > { %2988 = vst.msk [vmem:[%s4639_s20 + $0x28] sm:$0xff] %vm2982_vm10, %v2969_v43  ;;  %2989 = vst.msk [vmem:[%s4639_s20 + $0x30] sm:$0xff] %vm2982_vm10, %v2971_v45 }
 0x51e   : > { %v2973_v48 = vpop.permute.xlu1 %2972 }
 0x51f   : > { %2990 = vst.msk [vmem:[%s4639_s20 + $0x38] sm:$0xff] %vm2982_vm10, %v2973_v48 }
 0x520 PF: > { %s18_s29 = sadd.s32 1, %s3819_s29   ;;  %s4707_s27 = smov %s3815_s28 }
 0x521   : > { %p15_p5 = scmp.ge.s32.totalorder %s18_s29, 4   ;;  %s4708_s28 = smov %s4710_s30 }
 0x523   :  { %17 = sbr.rel (!%p15_p5) target bundleno = 2 (0x2), region = 96 }

</bundles_post_ra>
